<compile_context>
chip_gen: v7x
topology: tpu7x:2x2x1
jax: 0.10.0
libtpu: 0.0.40
codegen_flags: <defaults>
</compile_context>

<pallas_src>
import functools
import math

import jax
import jax.numpy as jnp
from jax.experimental import pallas as pl
from jax.experimental.pallas import tpu as pltpu


# ----------------------------- in-kernel helpers -----------------------------

def _relu(x):
    return jnp.maximum(x, 0.0)


def _multi_head_attention(q, k, v, num_head, scale):
    """softmax(q_h @ k_h^T * scale) @ v_h per head; heads are contiguous slices of
    the last dim (matches torch.split + cat over head slices).
    q: [Nq, F], k/v: [Nk, F]  ->  [Nq, F].  All f32 VMEM values."""
    F = q.shape[-1]
    d = F // num_head
    outs = []
    for h in range(num_head):                         # static unroll (num_head small)
        sl = slice(h * d, (h + 1) * d)
        qh, kh, vh = q[:, sl], k[:, sl], v[:, sl]
        s = jax.lax.dot_general(qh, kh, (((1,), (1,)), ((), ())),
                                preferred_element_type=jnp.float32) * scale
        s = s - jnp.max(s, axis=-1, keepdims=True)    # numerically-stable softmax
        p = jnp.exp(s)
        p = p * pl.reciprocal(jnp.sum(p, axis=-1, keepdims=True), approx=True)
        outs.append(jnp.dot(p, vh, preferred_element_type=jnp.float32))
    return jnp.concatenate(outs, axis=-1)


# ------------------- fused Conv2d + InstanceNorm + ReLU kernel -------------------

def _conv_in_relu_kernel(p_ref, w_ref, b_ref, o_ref, *, eps):
    """y = patches @ W + b, then per-(batch, channel) InstanceNorm over spatial, ReLU.
    p_ref: [1, OH*OW, K], w_ref: [K, Cout], b_ref: [1, Cout], o_ref: [1, OH*OW, Cout]."""
    x = p_ref[0].astype(jnp.float32)
    y = jnp.dot(x, w_ref[...].astype(jnp.float32),
                preferred_element_type=jnp.float32) + b_ref[...].astype(jnp.float32)
    mean = jnp.mean(y, axis=0, keepdims=True)                       # per channel
    var = jnp.mean(jnp.square(y - mean), axis=0, keepdims=True)     # biased (torch)
    y = (y - mean) * jax.lax.rsqrt(var + eps)
    o_ref[0] = _relu(y).astype(o_ref.dtype)


def _im2col_nhwc(x, kh, kw, stride, pad):
    """x: [B, H, W, C] -> patches [B, OH*OW, kh*kw*C].  Tiny XLA glue feeding the
    Pallas conv matmul (K = kh*kw*C = 128 here, lane aligned)."""
    B, H, W, C = x.shape
    OH = (H + 2 * pad - kh) // stride + 1
    OW = (W + 2 * pad - kw) // stride + 1
    xp = jnp.pad(x, ((0, 0), (pad, pad), (pad, pad), (0, 0)))
    cols = [xp[:, i:i + stride * OH:stride, j:j + stride * OW:stride, :]
            for i in range(kh) for j in range(kw)]
    patches = jnp.stack(cols, axis=3)                 # [B, OH, OW, kh*kw, C]
    return patches.reshape(B, OH * OW, kh * kw * C), OH, OW


def conv_in_relu_pallas(x_nhwc, w_mat, b, kh, kw, stride, pad, eps=1e-5):
    """Fused Conv2d(bias) + InstanceNorm2d(affine=False) + ReLU.  NHWC in/out."""
    B = x_nhwc.shape[0]
    patches, OH, OW = _im2col_nhwc(x_nhwc, kh, kw, stride, pad)
    K = patches.shape[-1]
    Cout = w_mat.shape[1]
    out = pl.pallas_call(
        functools.partial(_conv_in_relu_kernel, eps=eps),
        out_shape=jax.ShapeDtypeStruct((B, OH * OW, Cout), jnp.float32),
        grid=(B,),
        in_specs=[
            pl.BlockSpec((1, OH * OW, K), lambda i: (i, 0, 0)),
            pl.BlockSpec((K, Cout), lambda i: (0, 0)),
            pl.BlockSpec((1, Cout), lambda i: (0, 0)),
        ],
        out_specs=pl.BlockSpec((1, OH * OW, Cout), lambda i: (i, 0, 0)),
        compiler_params=pltpu.CompilerParams(dimension_semantics=("parallel",)),
    )(patches, w_mat, b)
    return out.reshape(B, OH, OW, Cout)


# ------------------------- fused InterModalityUpdate kernel -------------------------

def _inter_kernel(v_ds_ref, v_orig_ref, q_orig_ref,
                  map_w_ref, map_b_ref,
                  v_lin_w_ref, v_lin_b_ref, q_lin_w_ref, q_lin_b_ref,
                  v_out_w_ref, v_out_b_ref, q_out_w_ref, q_out_b_ref,
                  o_v_ref, o_q_ref, *, num_head, scale, v_size, q_size):
    f32 = jnp.float32
    v_tok = v_ds_ref[0].astype(f32)                   # [C, ds]  downsampled content
    q_raw = q_orig_ref[0].astype(f32)                 # [C, Sq]  original style tokens

    # map_style: Conv1x1 (channel mixing) + ReLU  ==  W_map @ q_tok + b
    q_tok = _relu(jnp.dot(map_w_ref[...], q_raw, preferred_element_type=f32)
                  + map_b_ref[...])

    # Dropout(p=0) + ReLU + Linear  ->  [C, 3F]
    v_trans = jnp.dot(_relu(v_tok), v_lin_w_ref[...],
                      preferred_element_type=f32) + v_lin_b_ref[...]
    q_trans = jnp.dot(_relu(q_tok), q_lin_w_ref[...],
                      preferred_element_type=f32) + q_lin_b_ref[...]

    F = v_trans.shape[-1] // 3                        # torch.split order: k, q, v
    v_k, v_q, v_v = v_trans[:, :F], v_trans[:, F:2 * F], v_trans[:, 2 * F:]
    q_k, q_q, q_v = q_trans[:, :F], q_trans[:, F:2 * F], q_trans[:, 2 * F:]

    v_update = _multi_head_attention(v_q, q_k, q_v, num_head, scale)   # q -> v flow
    q_update = _multi_head_attention(q_q, v_k, v_v, num_head, scale)   # v -> q flow

    # output linear on cat([origin, update]) done as split-weight matmuls (no concat)
    v_w = v_out_w_ref[...].astype(f32)
    q_w = q_out_w_ref[...].astype(f32)
    o_v_ref[0] = (jnp.dot(v_orig_ref[0].astype(f32), v_w[:v_size],
                          preferred_element_type=f32)
                  + jnp.dot(v_update, v_w[v_size:], preferred_element_type=f32)
                  + v_out_b_ref[...]).astype(o_v_ref.dtype)
    o_q_ref[0] = (jnp.dot(q_raw, q_w[:q_size], preferred_element_type=f32)
                  + jnp.dot(q_update, q_w[q_size:], preferred_element_type=f32)
                  + q_out_b_ref[...]).astype(o_q_ref.dtype)


def inter_modality_update(p, v_nchw, q_nchw, *, num_head, output_size):
    B, C, Hv, Wv = v_nchw.shape
    _, _, Hq, Wq = q_nchw.shape
    v_size, q_size = Hv * Wv, Hq * Wq
    v_origin = v_nchw.reshape(B, C, v_size)
    q_origin = q_nchw.reshape(B, C, q_size)

    # downsample_content: (Conv4x4/s2/p1 + InstanceNorm + ReLU) x 2, NHWC layout.
    v_nhwc = v_nchw.transpose(0, 2, 3, 1)
    v_nhwc = conv_in_relu_pallas(v_nhwc, p["conv1_w"], p["conv1_b"], 4, 4, 2, 1)
    v_nhwc = conv_in_relu_pallas(v_nhwc, p["conv2_w"], p["conv2_b"], 4, 4, 2, 1)
    _, OH, OW, _ = v_nhwc.shape
    # NHWC -> token matrix [B, num_obj, ds] (single tiny relayout; XLA glue)
    v_ds = v_nhwc.reshape(B, OH * OW, C).transpose(0, 2, 1)

    Fv_out = p["v_out_w"].shape[1]
    Fq_out = p["q_out_w"].shape[1]
    scale = 1.0 / math.sqrt(output_size // num_head)
    kern = functools.partial(_inter_kernel, num_head=num_head, scale=scale,
                             v_size=v_size, q_size=q_size)

    per_b = lambda a: pl.BlockSpec((1,) + a.shape[1:], lambda i: (i, 0, 0))
    full2 = lambda a: pl.BlockSpec(a.shape, lambda i: (0, 0))
    args = (v_ds, v_origin, q_origin,
            p["map_w"], p["map_b"],
            p["v_lin_w"], p["v_lin_b"], p["q_lin_w"], p["q_lin_b"],
            p["v_out_w"], p["v_out_b"], p["q_out_w"], p["q_out_b"])
    in_specs = [per_b(args[0]), per_b(args[1]), per_b(args[2])] + \
               [full2(a) for a in args[3:]]

    updated_v, updated_q = pl.pallas_call(
        kern,
        out_shape=(jax.ShapeDtypeStruct((B, C, Fv_out), jnp.float32),
                   jax.ShapeDtypeStruct((B, C, Fq_out), jnp.float32)),
        grid=(B,),
        in_specs=in_specs,
        out_specs=(pl.BlockSpec((1, C, Fv_out), lambda i: (i, 0, 0)),
                   pl.BlockSpec((1, C, Fq_out), lambda i: (i, 0, 0))),
        compiler_params=pltpu.CompilerParams(dimension_semantics=("parallel",)),
    )(*args)
    return updated_v, updated_q


# ----------------------- fused DyIntraModalityUpdate kernel -----------------------

def _intra_kernel(v_ref, q_ref,
                  v4q_w_ref, v4q_b_ref, q4v_w_ref, q4v_b_ref,
                  v_lin_w_ref, v_lin_b_ref, q_lin_w_ref, q_lin_b_ref,
                  v_out_w_ref, v_out_b_ref, q_out_w_ref, q_out_b_ref,
                  o_v_ref, o_q_ref, *, num_head, scale):
    f32 = jnp.float32
    v = v_ref[0].astype(f32)                          # [Nv, F]
    q = q_ref[0].astype(f32)                          # [Nq, F]

    v_mean = jnp.mean(v, axis=0, keepdims=True)       # sum(1)/num_obj   -> [1, F]
    q_mean = jnp.mean(q, axis=0, keepdims=True)
    v4q_gate = jax.nn.sigmoid(jnp.dot(_relu(v_mean), v4q_w_ref[...],
                                      preferred_element_type=f32) + v4q_b_ref[...])
    q4v_gate = jax.nn.sigmoid(jnp.dot(_relu(q_mean), q4v_w_ref[...],
                                      preferred_element_type=f32) + q4v_b_ref[...])

    v_trans = jnp.dot(_relu(v), v_lin_w_ref[...],
                      preferred_element_type=f32) + v_lin_b_ref[...]
    q_trans = jnp.dot(_relu(q), q_lin_w_ref[...],
                      preferred_element_type=f32) + q_lin_b_ref[...]
    F = v_trans.shape[-1] // 3
    v_k, v_q, v_v = v_trans[:, :F], v_trans[:, F:2 * F], v_trans[:, 2 * F:]
    q_k, q_q, q_v = q_trans[:, :F], q_trans[:, F:2 * F], q_trans[:, 2 * F:]

    gv = 1.0 + q4v_gate                               # broadcast over rows
    gq = 1.0 + v4q_gate
    v_update = _multi_head_attention(gv * v_q, gv * v_k, v_v, num_head, scale)  # v2v
    q_update = _multi_head_attention(gq * q_q, gq * q_k, q_v, num_head, scale)  # q2q

    o_v_ref[0] = (jnp.dot(v + v_update, v_out_w_ref[...], preferred_element_type=f32)
                  + v_out_b_ref[...]).astype(o_v_ref.dtype)
    o_q_ref[0] = (jnp.dot(q + q_update, q_out_w_ref[...], preferred_element_type=f32)
                  + q_out_b_ref[...]).astype(o_q_ref.dtype)


def dyintra_modality_update(p, v, q, *, num_head, output_size):
    B, Nv, _ = v.shape
    _, Nq, _ = q.shape
    scale = 1.0 / math.sqrt(output_size // num_head)
    kern = functools.partial(_intra_kernel, num_head=num_head, scale=scale)

    per_b = lambda a: pl.BlockSpec((1,) + a.shape[1:], lambda i: (i, 0, 0))
    full2 = lambda a: pl.BlockSpec(a.shape, lambda i: (0, 0))
    args = (v, q,
            p["v4q_w"], p["v4q_b"], p["q4v_w"], p["q4v_b"],
            p["v_lin_w"], p["v_lin_b"], p["q_lin_w"], p["q_lin_b"],
            p["v_out_w"], p["v_out_b"], p["q_out_w"], p["q_out_b"])
    in_specs = [per_b(v), per_b(q)] + [full2(a) for a in args[2:]]

    updated_v, updated_q = pl.pallas_call(
        kern,
        out_shape=(jax.ShapeDtypeStruct((B, Nv, output_size), jnp.float32),
                   jax.ShapeDtypeStruct((B, Nq, output_size), jnp.float32)),
        grid=(B,),
        in_specs=in_specs,
        out_specs=(pl.BlockSpec((1, Nv, output_size), lambda i: (i, 0, 0)),
                   pl.BlockSpec((1, Nq, output_size), lambda i: (i, 0, 0))),
        compiler_params=pltpu.CompilerParams(dimension_semantics=("parallel",)),
    )(*args)
    return updated_v, updated_q


# ----------------------------- module forward -----------------------------

def multiblock_forward(params, v, q, *, num_block, num_head, output_size):
    # TODO(synk): the original module instantiates the Inter block for every stacked
    # block, but blocks >= 1 would feed 3-D tensors into 4-D Conv2d with mutually
    # inconsistent feature sizes, so only num_block == 1 is runnable / supported.
    assert num_block == 1
    v, q = inter_modality_update(params["inter"], v, q,
                                 num_head=num_head, output_size=output_size)
    v, q = dyintra_modality_update(params["intra"], v, q,
                                   num_head=num_head, output_size=output_size)
    return v, q


# ----------------------------- parameter init -----------------------------

def _init_linear(key, fan_in, fan_out):
    kw, kb = jax.random.split(key)
    s = 1.0 / math.sqrt(fan_in)                 # PyTorch default Linear/Conv init range
    w = jax.random.uniform(kw, (fan_in, fan_out), jnp.float32, -s, s)
    b = jax.random.uniform(kb, (1, fan_out), jnp.float32, -s, s)
    return w, b


def init_params(key, *, C, ds, v_size, q_size, output_size):
    ks = iter(jax.random.split(key, 16))
    inter = {}
    inter["conv1_w"], inter["conv1_b"] = _init_linear(next(ks), 4 * 4 * C, C)
    inter["conv2_w"], inter["conv2_b"] = _init_linear(next(ks), 4 * 4 * C, C)
    mw, mb = _init_linear(next(ks), C, C)                    # 1x1 conv, (out,in) layout
    inter["map_w"], inter["map_b"] = mw, mb.reshape(C, 1)
    inter["v_lin_w"], inter["v_lin_b"] = _init_linear(next(ks), ds, 3 * output_size)
    inter["q_lin_w"], inter["q_lin_b"] = _init_linear(next(ks), ds, 3 * output_size)
    # TODO(synk): original v_output = Linear(output_size + v_size, v_size) is
    # shape-inconsistent with the DyIntra block that follows inside the stack
    # (which expects feature dim == output_size); emit output_size features instead.
    # Weight rows are ordered [origin_features; update_features] (concat order).
    inter["v_out_w"], inter["v_out_b"] = _init_linear(next(ks), v_size + output_size, output_size)
    inter["q_out_w"], inter["q_out_b"] = _init_linear(next(ks), q_size + output_size, q_size)

    intra = {}
    intra["v4q_w"], intra["v4q_b"] = _init_linear(next(ks), output_size, output_size)
    intra["q4v_w"], intra["q4v_b"] = _init_linear(next(ks), output_size, output_size)
    intra["v_lin_w"], intra["v_lin_b"] = _init_linear(next(ks), output_size, 3 * output_size)
    intra["q_lin_w"], intra["q_lin_b"] = _init_linear(next(ks), output_size, 3 * output_size)
    intra["v_out_w"], intra["v_out_b"] = _init_linear(next(ks), output_size, output_size)
    intra["q_out_w"], intra["q_out_b"] = _init_linear(next(ks), output_size, output_size)
    return {"inter": inter, "intra": intra}


# ----------------------------------- main ----------------------------------

if __name__ == "__main__":
    # Small shapes consistent with the forward dataflow:
    #   v: [B, C, 16, 16] -> downsampled 4x -> flattened feature dim 16 (= downsampled_size)
    #   q: [B, C, 4, 4]   -> 1x1 conv       -> flattened feature dim 16 (= downsampled_size)
    # (the hard-coded 256 conv channels / downsampled_size=256 are scaled down to C=8 / 16)
    B, C = 2, 8
    Hv = Wv = 16
    Hq = Wq = 4
    num_head = 2
    output_size = 16
    num_block = 1
    v_size = Hv * Wv            # 256
    q_size = Hq * Wq            # 16
    ds = (Hv // 4) * (Wv // 4)  # 16 == downsampled feature size

    key = jax.random.PRNGKey(0)
    kv, kq, kp = jax.random.split(key, 3)
    v = jax.random.normal(kv, (B, C, Hv, Wv), jnp.float32)
    q = jax.random.normal(kq, (B, C, Hq, Wq), jnp.float32)
    params = init_params(kp, C=C, ds=ds, v_size=v_size, q_size=q_size,
                         output_size=output_size)

    fwd = jax.jit(functools.partial(multiblock_forward, num_block=num_block,
                                    num_head=num_head, output_size=output_size))
    out_v, out_q = fwd(params, v, q)
    jax.block_until_ready((out_v, out_q))
    assert out_v.shape == (B, C, output_size), out_v.shape
    assert out_q.shape == (B, C, output_size), out_q.shape
    assert jnp.all(jnp.isfinite(out_v)) and jnp.all(jnp.isfinite(out_q))
    print("KERNEL_OK")
</pallas_src>

<mosaic_0001>
module attributes {stable_mosaic.version = 11 : i64} {
  func.func @_conv_in_relu_kernel(%arg0: i32, %arg1: memref<1x64x128xf32, #tpu.memory_space<vmem>>, %arg2: memref<128x8xf32, #tpu.memory_space<vmem>>, %arg3: memref<1x8xf32, #tpu.memory_space<vmem>>, %arg4: memref<1x64x8xf32, #tpu.memory_space<vmem>>) attributes {dimension_semantics = [#tpu.dimension_semantics<parallel>], iteration_bounds = array<i64: 2>, scalar_prefetch = 0 : i64, scratch_operands = 0 : i64, tpu.core_type = #tpu.core_type<tc>, window_params = [{transform_indices = @transform_0, window_bounds = array<i64: 1, 64, 128>}, {pipeline_mode = #tpu.pipeline_mode<synchronous>, transform_indices = @transform_1, window_bounds = array<i64: 128, 8>}, {pipeline_mode = #tpu.pipeline_mode<synchronous>, transform_indices = @transform_2, window_bounds = array<i64: 1, 8>}, {transform_indices = @transform_3, window_bounds = array<i64: 1, 64, 8>}]} {
    %c0 = arith.constant 0 : index
    %c0_0 = arith.constant 0 : index
    %c0_1 = arith.constant 0 : index
    %0 = vector.load %arg1[%c0, %c0_0, %c0_1] : memref<1x64x128xf32, #tpu.memory_space<vmem>>, vector<1x64x128xf32>
    %1 = vector.shape_cast %0 : vector<1x64x128xf32> to vector<64x128xf32>
    %c0_2 = arith.constant 0 : index
    %c0_3 = arith.constant 0 : index
    %2 = vector.load %arg2[%c0_2, %c0_3] : memref<128x8xf32, #tpu.memory_space<vmem>>, vector<128x8xf32>
    %cst = arith.constant dense<0.000000e+00> : vector<64x8xf32>
    %3 = tpu.matmul %1, %2, %cst {dimension_numbers = #tpu.dot_dimension_numbers<[1], [0], [0], [1], [0, 0, 1, 1], [], []>} : vector<64x128xf32>, vector<128x8xf32>, vector<64x8xf32> -> vector<64x8xf32>
    %c0_4 = arith.constant 0 : index
    %c0_5 = arith.constant 0 : index
    %4 = vector.load %arg3[%c0_4, %c0_5] : memref<1x8xf32, #tpu.memory_space<vmem>>, vector<1x8xf32>
    %5 = vector.broadcast %4 : vector<1x8xf32> to vector<64x8xf32>
    %6 = arith.addf %3, %5 : vector<64x8xf32>
    %cst_6 = arith.constant dense<0.000000e+00> : vector<8xf32>
    %7 = vector.multi_reduction <add>, %6, %cst_6 [0] : vector<64x8xf32> to vector<8xf32>
    %8 = vector.shape_cast %7 : vector<8xf32> to vector<1x8xf32>
    %cst_7 = arith.constant 6.400000e+01 : f32
    %9 = vector.broadcast %cst_7 : f32 to vector<1x8xf32>
    %10 = arith.divf %8, %9 : vector<1x8xf32>
    %11 = vector.broadcast %10 : vector<1x8xf32> to vector<64x8xf32>
    %12 = arith.subf %6, %11 : vector<64x8xf32>
    %13 = arith.mulf %12, %12 : vector<64x8xf32>
    %cst_8 = arith.constant dense<0.000000e+00> : vector<8xf32>
    %14 = vector.multi_reduction <add>, %13, %cst_8 [0] : vector<64x8xf32> to vector<8xf32>
    %15 = vector.shape_cast %14 : vector<8xf32> to vector<1x8xf32>
    %cst_9 = arith.constant 6.400000e+01 : f32
    %16 = vector.broadcast %cst_9 : f32 to vector<1x8xf32>
    %17 = arith.divf %15, %16 : vector<1x8xf32>
    %18 = vector.broadcast %10 : vector<1x8xf32> to vector<64x8xf32>
    %19 = arith.subf %6, %18 : vector<64x8xf32>
    %cst_10 = arith.constant 9.99999974E-6 : f32
    %20 = vector.broadcast %cst_10 : f32 to vector<1x8xf32>
    %21 = arith.addf %17, %20 : vector<1x8xf32>
    %22 = math.rsqrt %21 : vector<1x8xf32>
    %23 = vector.broadcast %22 : vector<1x8xf32> to vector<64x8xf32>
    %24 = arith.mulf %19, %23 : vector<64x8xf32>
    %cst_11 = arith.constant 0.000000e+00 : f32
    %25 = vector.broadcast %cst_11 : f32 to vector<64x8xf32>
    %26 = arith.maximumf %24, %25 : vector<64x8xf32>
    %c0_12 = arith.constant 0 : index
    %c0_13 = arith.constant 0 : index
    %c0_14 = arith.constant 0 : index
    %27 = vector.load %arg4[%c0_12, %c0_13, %c0_14] : memref<1x64x8xf32, #tpu.memory_space<vmem>>, vector<1x64x8xf32>
    %28 = vector.shape_cast %27 : vector<1x64x8xf32> to vector<64x8xf32>
    %29 = vector.shape_cast %26 : vector<64x8xf32> to vector<1x64x8xf32>
    tpu.vector_store %arg4[%c0_12, %c0_13, %c0_14], %29 {strides = array<i32>} : memref<1x64x8xf32, #tpu.memory_space<vmem>>, vector<1x64x8xf32>,
    return
  }
  func.func @transform_0(%arg0: i32) -> (i32, i32, i32) {
    %c0_i32 = arith.constant 0 : i32
    %c0_i32_0 = arith.constant 0 : i32
    %c0_i32_1 = arith.constant 0 : i32
    return %arg0, %c0_i32, %c0_i32_0 : i32, i32, i32
  }
  func.func @transform_1(%arg0: i32) -> (i32, i32) {
    %c0_i32 = arith.constant 0 : i32
    %c0_i32_0 = arith.constant 0 : i32
    %c0_i32_1 = arith.constant 0 : i32
    return %c0_i32, %c0_i32_0 : i32, i32
  }
  func.func @transform_2(%arg0: i32) -> (i32, i32) {
    %c0_i32 = arith.constant 0 : i32
    %c0_i32_0 = arith.constant 0 : i32
    %c0_i32_1 = arith.constant 0 : i32
    return %c0_i32, %c0_i32_0 : i32, i32
  }
  func.func @transform_3(%arg0: i32) -> (i32, i32, i32) {
    %c0_i32 = arith.constant 0 : i32
    %c0_i32_0 = arith.constant 0 : i32
    %c0_i32_1 = arith.constant 0 : i32
    return %arg0, %c0_i32, %c0_i32_0 : i32, i32, i32
  }
}

module attributes {stable_mosaic.version = 11 : i64} {
  func.func @_conv_in_relu_kernel(%arg0: i32, %arg1: memref<1x16x128xf32, #tpu.memory_space<vmem>>, %arg2: memref<128x8xf32, #tpu.memory_space<vmem>>, %arg3: memref<1x8xf32, #tpu.memory_space<vmem>>, %arg4: memref<1x16x8xf32, #tpu.memory_space<vmem>>) attributes {dimension_semantics = [#tpu.dimension_semantics<parallel>], iteration_bounds = array<i64: 2>, scalar_prefetch = 0 : i64, scratch_operands = 0 : i64, tpu.core_type = #tpu.core_type<tc>, window_params = [{transform_indices = @transform_0, window_bounds = array<i64: 1, 16, 128>}, {pipeline_mode = #tpu.pipeline_mode<synchronous>, transform_indices = @transform_1, window_bounds = array<i64: 128, 8>}, {pipeline_mode = #tpu.pipeline_mode<synchronous>, transform_indices = @transform_2, window_bounds = array<i64: 1, 8>}, {transform_indices = @transform_3, window_bounds = array<i64: 1, 16, 8>}]} {
    %c0 = arith.constant 0 : index
    %c0_0 = arith.constant 0 : index
    %c0_1 = arith.constant 0 : index
    %0 = vector.load %arg1[%c0, %c0_0, %c0_1] : memref<1x16x128xf32, #tpu.memory_space<vmem>>, vector<1x16x128xf32>
    %1 = vector.shape_cast %0 : vector<1x16x128xf32> to vector<16x128xf32>
    %c0_2 = arith.constant 0 : index
    %c0_3 = arith.constant 0 : index
    %2 = vector.load %arg2[%c0_2, %c0_3] : memref<128x8xf32, #tpu.memory_space<vmem>>, vector<128x8xf32>
    %cst = arith.constant dense<0.000000e+00> : vector<16x8xf32>
    %3 = tpu.matmul %1, %2, %cst {dimension_numbers = #tpu.dot_dimension_numbers<[1], [0], [0], [1], [0, 0, 1, 1], [], []>} : vector<16x128xf32>, vector<128x8xf32>, vector<16x8xf32> -> vector<16x8xf32>
    %c0_4 = arith.constant 0 : index
    %c0_5 = arith.constant 0 : index
    %4 = vector.load %arg3[%c0_4, %c0_5] : memref<1x8xf32, #tpu.memory_space<vmem>>, vector<1x8xf32>
    %5 = vector.broadcast %4 : vector<1x8xf32> to vector<16x8xf32>
    %6 = arith.addf %3, %5 : vector<16x8xf32>
    %cst_6 = arith.constant dense<0.000000e+00> : vector<8xf32>
    %7 = vector.multi_reduction <add>, %6, %cst_6 [0] : vector<16x8xf32> to vector<8xf32>
    %8 = vector.shape_cast %7 : vector<8xf32> to vector<1x8xf32>
    %cst_7 = arith.constant 1.600000e+01 : f32
    %9 = vector.broadcast %cst_7 : f32 to vector<1x8xf32>
    %10 = arith.divf %8, %9 : vector<1x8xf32>
    %11 = vector.broadcast %10 : vector<1x8xf32> to vector<16x8xf32>
    %12 = arith.subf %6, %11 : vector<16x8xf32>
    %13 = arith.mulf %12, %12 : vector<16x8xf32>
    %cst_8 = arith.constant dense<0.000000e+00> : vector<8xf32>
    %14 = vector.multi_reduction <add>, %13, %cst_8 [0] : vector<16x8xf32> to vector<8xf32>
    %15 = vector.shape_cast %14 : vector<8xf32> to vector<1x8xf32>
    %cst_9 = arith.constant 1.600000e+01 : f32
    %16 = vector.broadcast %cst_9 : f32 to vector<1x8xf32>
    %17 = arith.divf %15, %16 : vector<1x8xf32>
    %18 = vector.broadcast %10 : vector<1x8xf32> to vector<16x8xf32>
    %19 = arith.subf %6, %18 : vector<16x8xf32>
    %cst_10 = arith.constant 9.99999974E-6 : f32
    %20 = vector.broadcast %cst_10 : f32 to vector<1x8xf32>
    %21 = arith.addf %17, %20 : vector<1x8xf32>
    %22 = math.rsqrt %21 : vector<1x8xf32>
    %23 = vector.broadcast %22 : vector<1x8xf32> to vector<16x8xf32>
    %24 = arith.mulf %19, %23 : vector<16x8xf32>
    %cst_11 = arith.constant 0.000000e+00 : f32
    %25 = vector.broadcast %cst_11 : f32 to vector<16x8xf32>
    %26 = arith.maximumf %24, %25 : vector<16x8xf32>
    %c0_12 = arith.constant 0 : index
    %c0_13 = arith.constant 0 : index
    %c0_14 = arith.constant 0 : index
    %27 = vector.load %arg4[%c0_12, %c0_13, %c0_14] : memref<1x16x8xf32, #tpu.memory_space<vmem>>, vector<1x16x8xf32>
    %28 = vector.shape_cast %27 : vector<1x16x8xf32> to vector<16x8xf32>
    %29 = vector.shape_cast %26 : vector<16x8xf32> to vector<1x16x8xf32>
    tpu.vector_store %arg4[%c0_12, %c0_13, %c0_14], %29 {strides = array<i32>} : memref<1x16x8xf32, #tpu.memory_space<vmem>>, vector<1x16x8xf32>,
    return
  }
  func.func @transform_0(%arg0: i32) -> (i32, i32, i32) {
    %c0_i32 = arith.constant 0 : i32
    %c0_i32_0 = arith.constant 0 : i32
    %c0_i32_1 = arith.constant 0 : i32
    return %arg0, %c0_i32, %c0_i32_0 : i32, i32, i32
  }
  func.func @transform_1(%arg0: i32) -> (i32, i32) {
    %c0_i32 = arith.constant 0 : i32
    %c0_i32_0 = arith.constant 0 : i32
    %c0_i32_1 = arith.constant 0 : i32
    return %c0_i32, %c0_i32_0 : i32, i32
  }
  func.func @transform_2(%arg0: i32) -> (i32, i32) {
    %c0_i32 = arith.constant 0 : i32
    %c0_i32_0 = arith.constant 0 : i32
    %c0_i32_1 = arith.constant 0 : i32
    return %c0_i32, %c0_i32_0 : i32, i32
  }
  func.func @transform_3(%arg0: i32) -> (i32, i32, i32) {
    %c0_i32 = arith.constant 0 : i32
    %c0_i32_0 = arith.constant 0 : i32
    %c0_i32_1 = arith.constant 0 : i32
    return %arg0, %c0_i32, %c0_i32_0 : i32, i32, i32
  }
}

module attributes {stable_mosaic.version = 11 : i64} {
  func.func @_intra_kernel(%arg0: i32, %arg1: memref<1x8x16xf32, #tpu.memory_space<vmem>>, %arg2: memref<1x8x16xf32, #tpu.memory_space<vmem>>, %arg3: memref<16x16xf32, #tpu.memory_space<vmem>>, %arg4: memref<1x16xf32, #tpu.memory_space<vmem>>, %arg5: memref<16x16xf32, #tpu.memory_space<vmem>>, %arg6: memref<1x16xf32, #tpu.memory_space<vmem>>, %arg7: memref<16x48xf32, #tpu.memory_space<vmem>>, %arg8: memref<1x48xf32, #tpu.memory_space<vmem>>, %arg9: memref<16x48xf32, #tpu.memory_space<vmem>>, %arg10: memref<1x48xf32, #tpu.memory_space<vmem>>, %arg11: memref<16x16xf32, #tpu.memory_space<vmem>>, %arg12: memref<1x16xf32, #tpu.memory_space<vmem>>, %arg13: memref<16x16xf32, #tpu.memory_space<vmem>>, %arg14: memref<1x16xf32, #tpu.memory_space<vmem>>, %arg15: memref<1x8x16xf32, #tpu.memory_space<vmem>>, %arg16: memref<1x8x16xf32, #tpu.memory_space<vmem>>) attributes {dimension_semantics = [#tpu.dimension_semantics<parallel>], iteration_bounds = array<i64: 2>, scalar_prefetch = 0 : i64, scratch_operands = 0 : i64, tpu.core_type = #tpu.core_type<tc>, window_params = [{transform_indices = @transform_0, window_bounds = array<i64: 1, 8, 16>}, {transform_indices = @transform_1, window_bounds = array<i64: 1, 8, 16>}, {pipeline_mode = #tpu.pipeline_mode<synchronous>, transform_indices = @transform_2, window_bounds = array<i64: 16, 16>}, {pipeline_mode = #tpu.pipeline_mode<synchronous>, transform_indices = @transform_3, window_bounds = array<i64: 1, 16>}, {pipeline_mode = #tpu.pipeline_mode<synchronous>, transform_indices = @transform_4, window_bounds = array<i64: 16, 16>}, {pipeline_mode = #tpu.pipeline_mode<synchronous>, transform_indices = @transform_5, window_bounds = array<i64: 1, 16>}, {pipeline_mode = #tpu.pipeline_mode<synchronous>, transform_indices = @transform_6, window_bounds = array<i64: 16, 48>}, {pipeline_mode = #tpu.pipeline_mode<synchronous>, transform_indices = @transform_7, window_bounds = array<i64: 1, 48>}, {pipeline_mode = #tpu.pipeline_mode<synchronous>, transform_indices = @transform_8, window_bounds = array<i64: 16, 48>}, {pipeline_mode = #tpu.pipeline_mode<synchronous>, transform_indices = @transform_9, window_bounds = array<i64: 1, 48>}, {pipeline_mode = #tpu.pipeline_mode<synchronous>, transform_indices = @transform_10, window_bounds = array<i64: 16, 16>}, {pipeline_mode = #tpu.pipeline_mode<synchronous>, transform_indices = @transform_11, window_bounds = array<i64: 1, 16>}, {pipeline_mode = #tpu.pipeline_mode<synchronous>, transform_indices = @transform_12, window_bounds = array<i64: 16, 16>}, {pipeline_mode = #tpu.pipeline_mode<synchronous>, transform_indices = @transform_13, window_bounds = array<i64: 1, 16>}, {transform_indices = @transform_14, window_bounds = array<i64: 1, 8, 16>}, {transform_indices = @transform_15, window_bounds = array<i64: 1, 8, 16>}]} {
    %c0 = arith.constant 0 : index
    %c0_0 = arith.constant 0 : index
    %c0_1 = arith.constant 0 : index
    %0 = vector.load %arg1[%c0, %c0_0, %c0_1] : memref<1x8x16xf32, #tpu.memory_space<vmem>>, vector<1x8x16xf32>
    %1 = vector.shape_cast %0 : vector<1x8x16xf32> to vector<8x16xf32>
    %c0_2 = arith.constant 0 : index
    %c0_3 = arith.constant 0 : index
    %c0_4 = arith.constant 0 : index
    %2 = vector.load %arg2[%c0_2, %c0_3, %c0_4] : memref<1x8x16xf32, #tpu.memory_space<vmem>>, vector<1x8x16xf32>
    %3 = vector.shape_cast %2 : vector<1x8x16xf32> to vector<8x16xf32>
    %cst = arith.constant dense<0.000000e+00> : vector<16xf32>
    %4 = vector.multi_reduction <add>, %1, %cst [0] : vector<8x16xf32> to vector<16xf32>
    %5 = vector.shape_cast %4 : vector<16xf32> to vector<1x16xf32>
    %cst_5 = arith.constant 8.000000e+00 : f32
    %6 = vector.broadcast %cst_5 : f32 to vector<1x16xf32>
    %7 = arith.divf %5, %6 : vector<1x16xf32>
    %cst_6 = arith.constant dense<0.000000e+00> : vector<16xf32>
    %8 = vector.multi_reduction <add>, %3, %cst_6 [0] : vector<8x16xf32> to vector<16xf32>
    %9 = vector.shape_cast %8 : vector<16xf32> to vector<1x16xf32>
    %cst_7 = arith.constant 8.000000e+00 : f32
    %10 = vector.broadcast %cst_7 : f32 to vector<1x16xf32>
    %11 = arith.divf %9, %10 : vector<1x16xf32>
    %cst_8 = arith.constant 0.000000e+00 : f32
    %12 = vector.broadcast %cst_8 : f32 to vector<1x16xf32>
    %13 = arith.maximumf %7, %12 : vector<1x16xf32>
    %c0_9 = arith.constant 0 : index
    %c0_10 = arith.constant 0 : index
    %14 = vector.load %arg3[%c0_9, %c0_10] : memref<16x16xf32, #tpu.memory_space<vmem>>, vector<16x16xf32>
    %cst_11 = arith.constant dense<0.000000e+00> : vector<1x16xf32>
    %15 = tpu.matmul %13, %14, %cst_11 {dimension_numbers = #tpu.dot_dimension_numbers<[1], [0], [0], [1], [0, 0, 1, 1], [], []>} : vector<1x16xf32>, vector<16x16xf32>, vector<1x16xf32> -> vector<1x16xf32>
    %c0_12 = arith.constant 0 : index
    %c0_13 = arith.constant 0 : index
    %16 = vector.load %arg4[%c0_12, %c0_13] : memref<1x16xf32, #tpu.memory_space<vmem>>, vector<1x16xf32>
    %17 = arith.addf %15, %16 : vector<1x16xf32>
    %18 = arith.negf %17 : vector<1x16xf32>
    %19 = math.exp %18 : vector<1x16xf32>
    %cst_14 = arith.constant 1.000000e+00 : f32
    %20 = vector.broadcast %cst_14 : f32 to vector<1x16xf32>
    %21 = arith.addf %20, %19 : vector<1x16xf32>
    %22 = arith.divf %20, %21 : vector<1x16xf32>
    %cst_15 = arith.constant 0.000000e+00 : f32
    %23 = vector.broadcast %cst_15 : f32 to vector<1x16xf32>
    %24 = arith.maximumf %11, %23 : vector<1x16xf32>
    %c0_16 = arith.constant 0 : index
    %c0_17 = arith.constant 0 : index
    %25 = vector.load %arg5[%c0_16, %c0_17] : memref<16x16xf32, #tpu.memory_space<vmem>>, vector<16x16xf32>
    %cst_18 = arith.constant dense<0.000000e+00> : vector<1x16xf32>
    %26 = tpu.matmul %24, %25, %cst_18 {dimension_numbers = #tpu.dot_dimension_numbers<[1], [0], [0], [1], [0, 0, 1, 1], [], []>} : vector<1x16xf32>, vector<16x16xf32>, vector<1x16xf32> -> vector<1x16xf32>
    %c0_19 = arith.constant 0 : index
    %c0_20 = arith.constant 0 : index
    %27 = vector.load %arg6[%c0_19, %c0_20] : memref<1x16xf32, #tpu.memory_space<vmem>>, vector<1x16xf32>
    %28 = arith.addf %26, %27 : vector<1x16xf32>
    %29 = arith.negf %28 : vector<1x16xf32>
    %30 = math.exp %29 : vector<1x16xf32>
    %cst_21 = arith.constant 1.000000e+00 : f32
    %31 = vector.broadcast %cst_21 : f32 to vector<1x16xf32>
    %32 = arith.addf %31, %30 : vector<1x16xf32>
    %33 = arith.divf %31, %32 : vector<1x16xf32>
    %cst_22 = arith.constant 0.000000e+00 : f32
    %34 = vector.broadcast %cst_22 : f32 to vector<8x16xf32>
    %35 = arith.maximumf %1, %34 : vector<8x16xf32>
    %c0_23 = arith.constant 0 : index
    %c0_24 = arith.constant 0 : index
    %36 = vector.load %arg7[%c0_23, %c0_24] : memref<16x48xf32, #tpu.memory_space<vmem>>, vector<16x48xf32>
    %cst_25 = arith.constant dense<0.000000e+00> : vector<8x48xf32>
    %37 = tpu.matmul %35, %36, %cst_25 {dimension_numbers = #tpu.dot_dimension_numbers<[1], [0], [0], [1], [0, 0, 1, 1], [], []>} : vector<8x16xf32>, vector<16x48xf32>, vector<8x48xf32> -> vector<8x48xf32>
    %c0_26 = arith.constant 0 : index
    %c0_27 = arith.constant 0 : index
    %38 = vector.load %arg8[%c0_26, %c0_27] : memref<1x48xf32, #tpu.memory_space<vmem>>, vector<1x48xf32>
    %39 = vector.broadcast %38 : vector<1x48xf32> to vector<8x48xf32>
    %40 = arith.addf %37, %39 : vector<8x48xf32>
    %cst_28 = arith.constant 0.000000e+00 : f32
    %41 = vector.broadcast %cst_28 : f32 to vector<8x16xf32>
    %42 = arith.maximumf %3, %41 : vector<8x16xf32>
    %c0_29 = arith.constant 0 : index
    %c0_30 = arith.constant 0 : index
    %43 = vector.load %arg9[%c0_29, %c0_30] : memref<16x48xf32, #tpu.memory_space<vmem>>, vector<16x48xf32>
    %cst_31 = arith.constant dense<0.000000e+00> : vector<8x48xf32>
    %44 = tpu.matmul %42, %43, %cst_31 {dimension_numbers = #tpu.dot_dimension_numbers<[1], [0], [0], [1], [0, 0, 1, 1], [], []>} : vector<8x16xf32>, vector<16x48xf32>, vector<8x48xf32> -> vector<8x48xf32>
    %c0_32 = arith.constant 0 : index
    %c0_33 = arith.constant 0 : index
    %45 = vector.load %arg10[%c0_32, %c0_33] : memref<1x48xf32, #tpu.memory_space<vmem>>, vector<1x48xf32>
    %46 = vector.broadcast %45 : vector<1x48xf32> to vector<8x48xf32>
    %47 = arith.addf %44, %46 : vector<8x48xf32>
    %48 = vector.extract_strided_slice %40 {offsets = [0, 0], sizes = [8, 16], strides = [1, 1]} : vector<8x48xf32> to vector<8x16xf32>
    %49 = vector.extract_strided_slice %40 {offsets = [0, 16], sizes = [8, 16], strides = [1, 1]} : vector<8x48xf32> to vector<8x16xf32>
    %50 = vector.extract_strided_slice %40 {offsets = [0, 32], sizes = [8, 16], strides = [1, 1]} : vector<8x48xf32> to vector<8x16xf32>
    %51 = vector.extract_strided_slice %47 {offsets = [0, 0], sizes = [8, 16], strides = [1, 1]} : vector<8x48xf32> to vector<8x16xf32>
    %52 = vector.extract_strided_slice %47 {offsets = [0, 16], sizes = [8, 16], strides = [1, 1]} : vector<8x48xf32> to vector<8x16xf32>
    %53 = vector.extract_strided_slice %47 {offsets = [0, 32], sizes = [8, 16], strides = [1, 1]} : vector<8x48xf32> to vector<8x16xf32>
    %cst_34 = arith.constant 1.000000e+00 : f32
    %54 = vector.broadcast %cst_34 : f32 to vector<1x16xf32>
    %55 = arith.addf %54, %33 : vector<1x16xf32>
    %cst_35 = arith.constant 1.000000e+00 : f32
    %56 = vector.broadcast %cst_35 : f32 to vector<1x16xf32>
    %57 = arith.addf %56, %22 : vector<1x16xf32>
    %58 = vector.broadcast %55 : vector<1x16xf32> to vector<8x16xf32>
    %59 = arith.mulf %58, %49 : vector<8x16xf32>
    %60 = vector.broadcast %55 : vector<1x16xf32> to vector<8x16xf32>
    %61 = arith.mulf %60, %48 : vector<8x16xf32>
    %62 = vector.extract_strided_slice %59 {offsets = [0, 0], sizes = [8, 8], strides = [1, 1]} : vector<8x16xf32> to vector<8x8xf32>
    %63 = vector.extract_strided_slice %61 {offsets = [0, 0], sizes = [8, 8], strides = [1, 1]} : vector<8x16xf32> to vector<8x8xf32>
    %64 = vector.extract_strided_slice %50 {offsets = [0, 0], sizes = [8, 8], strides = [1, 1]} : vector<8x16xf32> to vector<8x8xf32>
    %cst_36 = arith.constant dense<0.000000e+00> : vector<8x8xf32>
    %65 = tpu.matmul %62, %63, %cst_36 {dimension_numbers = #tpu.dot_dimension_numbers<[1], [1], [0], [0], [0, 0, 1, 0], [], []>} : vector<8x8xf32>, vector<8x8xf32>, vector<8x8xf32> -> vector<8x8xf32>
    %cst_37 = arith.constant 0.353553385 : f32
    %66 = vector.broadcast %cst_37 : f32 to vector<8x8xf32>
    %67 = arith.mulf %65, %66 : vector<8x8xf32>
    %cst_38 = arith.constant dense<0xFF800000> : vector<8xf32>
    %68 = vector.multi_reduction <maximumf>, %67, %cst_38 [1] : vector<8x8xf32> to vector<8xf32>
    %69 = vector.shape_cast %68 : vector<8xf32> to vector<8x1xf32>
    %70 = vector.broadcast %69 : vector<8x1xf32> to vector<8x8xf32>
    %71 = arith.subf %67, %70 : vector<8x8xf32>
    %72 = math.exp %71 : vector<8x8xf32>
    %cst_39 = arith.constant dense<0.000000e+00> : vector<8xf32>
    %73 = vector.multi_reduction <add>, %72, %cst_39 [1] : vector<8x8xf32> to vector<8xf32>
    %74 = vector.shape_cast %73 : vector<8xf32> to vector<8x1xf32>
    %75 = tpu.reciprocal %74 {approx = true} : vector<8x1xf32> -> vector<8x1xf32>
    %76 = vector.broadcast %75 : vector<8x1xf32> to vector<8x8xf32>
    %77 = arith.mulf %72, %76 : vector<8x8xf32>
    %cst_40 = arith.constant dense<0.000000e+00> : vector<8x8xf32>
    %78 = tpu.matmul %77, %64, %cst_40 {dimension_numbers = #tpu.dot_dimension_numbers<[1], [0], [0], [1], [0, 0, 1, 1], [], []>} : vector<8x8xf32>, vector<8x8xf32>, vector<8x8xf32> -> vector<8x8xf32>
    %79 = vector.extract_strided_slice %59 {offsets = [0, 8], sizes = [8, 8], strides = [1, 1]} : vector<8x16xf32> to vector<8x8xf32>
    %80 = vector.extract_strided_slice %61 {offsets = [0, 8], sizes = [8, 8], strides = [1, 1]} : vector<8x16xf32> to vector<8x8xf32>
    %81 = vector.extract_strided_slice %50 {offsets = [0, 8], sizes = [8, 8], strides = [1, 1]} : vector<8x16xf32> to vector<8x8xf32>
    %cst_41 = arith.constant dense<0.000000e+00> : vector<8x8xf32>
    %82 = tpu.matmul %79, %80, %cst_41 {dimension_numbers = #tpu.dot_dimension_numbers<[1], [1], [0], [0], [0, 0, 1, 0], [], []>} : vector<8x8xf32>, vector<8x8xf32>, vector<8x8xf32> -> vector<8x8xf32>
    %cst_42 = arith.constant 0.353553385 : f32
    %83 = vector.broadcast %cst_42 : f32 to vector<8x8xf32>
    %84 = arith.mulf %82, %83 : vector<8x8xf32>
    %cst_43 = arith.constant dense<0xFF800000> : vector<8xf32>
    %85 = vector.multi_reduction <maximumf>, %84, %cst_43 [1] : vector<8x8xf32> to vector<8xf32>
    %86 = vector.shape_cast %85 : vector<8xf32> to vector<8x1xf32>
    %87 = vector.broadcast %86 : vector<8x1xf32> to vector<8x8xf32>
    %88 = arith.subf %84, %87 : vector<8x8xf32>
    %89 = math.exp %88 : vector<8x8xf32>
    %cst_44 = arith.constant dense<0.000000e+00> : vector<8xf32>
    %90 = vector.multi_reduction <add>, %89, %cst_44 [1] : vector<8x8xf32> to vector<8xf32>
    %91 = vector.shape_cast %90 : vector<8xf32> to vector<8x1xf32>
    %92 = tpu.reciprocal %91 {approx = true} : vector<8x1xf32> -> vector<8x1xf32>
    %93 = vector.broadcast %92 : vector<8x1xf32> to vector<8x8xf32>
    %94 = arith.mulf %89, %93 : vector<8x8xf32>
    %cst_45 = arith.constant dense<0.000000e+00> : vector<8x8xf32>
    %95 = tpu.matmul %94, %81, %cst_45 {dimension_numbers = #tpu.dot_dimension_numbers<[1], [0], [0], [1], [0, 0, 1, 1], [], []>} : vector<8x8xf32>, vector<8x8xf32>, vector<8x8xf32> -> vector<8x8xf32>
    %96 = tpu.concatenate %78, %95 in 1 : vector<8x8xf32>, vector<8x8xf32> -> vector<8x16xf32>
    %97 = vector.broadcast %57 : vector<1x16xf32> to vector<8x16xf32>
    %98 = arith.mulf %97, %52 : vector<8x16xf32>
    %99 = vector.broadcast %57 : vector<1x16xf32> to vector<8x16xf32>
    %100 = arith.mulf %99, %51 : vector<8x16xf32>
    %101 = vector.extract_strided_slice %98 {offsets = [0, 0], sizes = [8, 8], strides = [1, 1]} : vector<8x16xf32> to vector<8x8xf32>
    %102 = vector.extract_strided_slice %100 {offsets = [0, 0], sizes = [8, 8], strides = [1, 1]} : vector<8x16xf32> to vector<8x8xf32>
    %103 = vector.extract_strided_slice %53 {offsets = [0, 0], sizes = [8, 8], strides = [1, 1]} : vector<8x16xf32> to vector<8x8xf32>
    %cst_46 = arith.constant dense<0.000000e+00> : vector<8x8xf32>
    %104 = tpu.matmul %101, %102, %cst_46 {dimension_numbers = #tpu.dot_dimension_numbers<[1], [1], [0], [0], [0, 0, 1, 0], [], []>} : vector<8x8xf32>, vector<8x8xf32>, vector<8x8xf32> -> vector<8x8xf32>
    %cst_47 = arith.constant 0.353553385 : f32
    %105 = vector.broadcast %cst_47 : f32 to vector<8x8xf32>
    %106 = arith.mulf %104, %105 : vector<8x8xf32>
    %cst_48 = arith.constant dense<0xFF800000> : vector<8xf32>
    %107 = vector.multi_reduction <maximumf>, %106, %cst_48 [1] : vector<8x8xf32> to vector<8xf32>
    %108 = vector.shape_cast %107 : vector<8xf32> to vector<8x1xf32>
    %109 = vector.broadcast %108 : vector<8x1xf32> to vector<8x8xf32>
    %110 = arith.subf %106, %109 : vector<8x8xf32>
    %111 = math.exp %110 : vector<8x8xf32>
    %cst_49 = arith.constant dense<0.000000e+00> : vector<8xf32>
    %112 = vector.multi_reduction <add>, %111, %cst_49 [1] : vector<8x8xf32> to vector<8xf32>
    %113 = vector.shape_cast %112 : vector<8xf32> to vector<8x1xf32>
    %114 = tpu.reciprocal %113 {approx = true} : vector<8x1xf32> -> vector<8x1xf32>
    %115 = vector.broadcast %114 : vector<8x1xf32> to vector<8x8xf32>
    %116 = arith.mulf %111, %115 : vector<8x8xf32>
    %cst_50 = arith.constant dense<0.000000e+00> : vector<8x8xf32>
    %117 = tpu.matmul %116, %103, %cst_50 {dimension_numbers = #tpu.dot_dimension_numbers<[1], [0], [0], [1], [0, 0, 1, 1], [], []>} : vector<8x8xf32>, vector<8x8xf32>, vector<8x8xf32> -> vector<8x8xf32>
    %118 = vector.extract_strided_slice %98 {offsets = [0, 8], sizes = [8, 8], strides = [1, 1]} : vector<8x16xf32> to vector<8x8xf32>
    %119 = vector.extract_strided_slice %100 {offsets = [0, 8], sizes = [8, 8], strides = [1, 1]} : vector<8x16xf32> to vector<8x8xf32>
    %120 = vector.extract_strided_slice %53 {offsets = [0, 8], sizes = [8, 8], strides = [1, 1]} : vector<8x16xf32> to vector<8x8xf32>
    %cst_51 = arith.constant dense<0.000000e+00> : vector<8x8xf32>
    %121 = tpu.matmul %118, %119, %cst_51 {dimension_numbers = #tpu.dot_dimension_numbers<[1], [1], [0], [0], [0, 0, 1, 0], [], []>} : vector<8x8xf32>, vector<8x8xf32>, vector<8x8xf32> -> vector<8x8xf32>
    %cst_52 = arith.constant 0.353553385 : f32
    %122 = vector.broadcast %cst_52 : f32 to vector<8x8xf32>
    %123 = arith.mulf %121, %122 : vector<8x8xf32>
    %cst_53 = arith.constant dense<0xFF800000> : vector<8xf32>
    %124 = vector.multi_reduction <maximumf>, %123, %cst_53 [1] : vector<8x8xf32> to vector<8xf32>
    %125 = vector.shape_cast %124 : vector<8xf32> to vector<8x1xf32>
    %126 = vector.broadcast %125 : vector<8x1xf32> to vector<8x8xf32>
    %127 = arith.subf %123, %126 : vector<8x8xf32>
    %128 = math.exp %127 : vector<8x8xf32>
    %cst_54 = arith.constant dense<0.000000e+00> : vector<8xf32>
    %129 = vector.multi_reduction <add>, %128, %cst_54 [1] : vector<8x8xf32> to vector<8xf32>
    %130 = vector.shape_cast %129 : vector<8xf32> to vector<8x1xf32>
    %131 = tpu.reciprocal %130 {approx = true} : vector<8x1xf32> -> vector<8x1xf32>
    %132 = vector.broadcast %131 : vector<8x1xf32> to vector<8x8xf32>
    %133 = arith.mulf %128, %132 : vector<8x8xf32>
    %cst_55 = arith.constant dense<0.000000e+00> : vector<8x8xf32>
    %134 = tpu.matmul %133, %120, %cst_55 {dimension_numbers = #tpu.dot_dimension_numbers<[1], [0], [0], [1], [0, 0, 1, 1], [], []>} : vector<8x8xf32>, vector<8x8xf32>, vector<8x8xf32> -> vector<8x8xf32>
    %135 = tpu.concatenate %117, %134 in 1 : vector<8x8xf32>, vector<8x8xf32> -> vector<8x16xf32>
    %136 = arith.addf %1, %96 : vector<8x16xf32>
    %c0_56 = arith.constant 0 : index
    %c0_57 = arith.constant 0 : index
    %137 = vector.load %arg11[%c0_56, %c0_57] : memref<16x16xf32, #tpu.memory_space<vmem>>, vector<16x16xf32>
    %cst_58 = arith.constant dense<0.000000e+00> : vector<8x16xf32>
    %138 = tpu.matmul %136, %137, %cst_58 {dimension_numbers = #tpu.dot_dimension_numbers<[1], [0], [0], [1], [0, 0, 1, 1], [], []>} : vector<8x16xf32>, vector<16x16xf32>, vector<8x16xf32> -> vector<8x16xf32>
    %c0_59 = arith.constant 0 : index
    %c0_60 = arith.constant 0 : index
    %139 = vector.load %arg12[%c0_59, %c0_60] : memref<1x16xf32, #tpu.memory_space<vmem>>, vector<1x16xf32>
    %140 = vector.broadcast %139 : vector<1x16xf32> to vector<8x16xf32>
    %141 = arith.addf %138, %140 : vector<8x16xf32>
    %c0_61 = arith.constant 0 : index
    %c0_62 = arith.constant 0 : index
    %c0_63 = arith.constant 0 : index
    %142 = vector.load %arg15[%c0_61, %c0_62, %c0_63] : memref<1x8x16xf32, #tpu.memory_space<vmem>>, vector<1x8x16xf32>
    %143 = vector.shape_cast %142 : vector<1x8x16xf32> to vector<8x16xf32>
    %144 = vector.shape_cast %141 : vector<8x16xf32> to vector<1x8x16xf32>
    tpu.vector_store %arg15[%c0_61, %c0_62, %c0_63], %144 {strides = array<i32>} : memref<1x8x16xf32, #tpu.memory_space<vmem>>, vector<1x8x16xf32>,
    %145 = arith.addf %3, %135 : vector<8x16xf32>
    %c0_64 = arith.constant 0 : index
    %c0_65 = arith.constant 0 : index
    %146 = vector.load %arg13[%c0_64, %c0_65] : memref<16x16xf32, #tpu.memory_space<vmem>>, vector<16x16xf32>
    %cst_66 = arith.constant dense<0.000000e+00> : vector<8x16xf32>
    %147 = tpu.matmul %145, %146, %cst_66 {dimension_numbers = #tpu.dot_dimension_numbers<[1], [0], [0], [1], [0, 0, 1, 1], [], []>} : vector<8x16xf32>, vector<16x16xf32>, vector<8x16xf32> -> vector<8x16xf32>
    %c0_67 = arith.constant 0 : index
    %c0_68 = arith.constant 0 : index
    %148 = vector.load %arg14[%c0_67, %c0_68] : memref<1x16xf32, #tpu.memory_space<vmem>>, vector<1x16xf32>
    %149 = vector.broadcast %148 : vector<1x16xf32> to vector<8x16xf32>
    %150 = arith.addf %147, %149 : vector<8x16xf32>
    %c0_69 = arith.constant 0 : index
    %c0_70 = arith.constant 0 : index
    %c0_71 = arith.constant 0 : index
    %151 = vector.load %arg16[%c0_69, %c0_70, %c0_71] : memref<1x8x16xf32, #tpu.memory_space<vmem>>, vector<1x8x16xf32>
    %152 = vector.shape_cast %151 : vector<1x8x16xf32> to vector<8x16xf32>
    %153 = vector.shape_cast %150 : vector<8x16xf32> to vector<1x8x16xf32>
    tpu.vector_store %arg16[%c0_69, %c0_70, %c0_71], %153 {strides = array<i32>} : memref<1x8x16xf32, #tpu.memory_space<vmem>>, vector<1x8x16xf32>,
    return
  }
  func.func @transform_0(%arg0: i32) -> (i32, i32, i32) {
    %c0_i32 = arith.constant 0 : i32
    %c0_i32_0 = arith.constant 0 : i32
    %c0_i32_1 = arith.constant 0 : i32
    return %arg0, %c0_i32, %c0_i32_0 : i32, i32, i32
  }
  func.func @transform_1(%arg0: i32) -> (i32, i32, i32) {
    %c0_i32 = arith.constant 0 : i32
    %c0_i32_0 = arith.constant 0 : i32
    %c0_i32_1 = arith.constant 0 : i32
    return %arg0, %c0_i32, %c0_i32_0 : i32, i32, i32
  }
  func.func @transform_2(%arg0: i32) -> (i32, i32) {
    %c0_i32 = arith.constant 0 : i32
    %c0_i32_0 = arith.constant 0 : i32
    %c0_i32_1 = arith.constant 0 : i32
    return %c0_i32, %c0_i32_0 : i32, i32
  }
  func.func @transform_3(%arg0: i32) -> (i32, i32) {
    %c0_i32 = arith.constant 0 : i32
    %c0_i32_0 = arith.constant 0 : i32
    %c0_i32_1 = arith.constant 0 : i32
    return %c0_i32, %c0_i32_0 : i32, i32
  }
  func.func @transform_4(%arg0: i32) -> (i32, i32) {
    %c0_i32 = arith.constant 0 : i32
    %c0_i32_0 = arith.constant 0 : i32
    %c0_i32_1 = arith.constant 0 : i32
    return %c0_i32, %c0_i32_0 : i32, i32
  }
  func.func @transform_5(%arg0: i32) -> (i32, i32) {
    %c0_i32 = arith.constant 0 : i32
    %c0_i32_0 = arith.constant 0 : i32
    %c0_i32_1 = arith.constant 0 : i32
    return %c0_i32, %c0_i32_0 : i32, i32
  }
  func.func @transform_6(%arg0: i32) -> (i32, i32) {
    %c0_i32 = arith.constant 0 : i32
    %c0_i32_0 = arith.constant 0 : i32
    %c0_i32_1 = arith.constant 0 : i32
    return %c0_i32, %c0_i32_0 : i32, i32
  }
  func.func @transform_7(%arg0: i32) -> (i32, i32) {
    %c0_i32 = arith.constant 0 : i32
    %c0_i32_0 = arith.constant 0 : i32
    %c0_i32_1 = arith.constant 0 : i32
    return %c0_i32, %c0_i32_0 : i32, i32
  }
  func.func @transform_8(%arg0: i32) -> (i32, i32) {
    %c0_i32 = arith.constant 0 : i32
    %c0_i32_0 = arith.constant 0 : i32
    %c0_i32_1 = arith.constant 0 : i32
    return %c0_i32, %c0_i32_0 : i32, i32
  }
  func.func @transform_9(%arg0: i32) -> (i32, i32) {
    %c0_i32 = arith.constant 0 : i32
    %c0_i32_0 = arith.constant 0 : i32
    %c0_i32_1 = arith.constant 0 : i32
    return %c0_i32, %c0_i32_0 : i32, i32
  }
  func.func @transform_10(%arg0: i32) -> (i32, i32) {
    %c0_i32 = arith.constant 0 : i32
    %c0_i32_0 = arith.constant 0 : i32
    %c0_i32_1 = arith.constant 0 : i32
    return %c0_i32, %c0_i32_0 : i32, i32
  }
  func.func @transform_11(%arg0: i32) -> (i32, i32) {
    %c0_i32 = arith.constant 0 : i32
    %c0_i32_0 = arith.constant 0 : i32
    %c0_i32_1 = arith.constant 0 : i32
    return %c0_i32, %c0_i32_0 : i32, i32
  }
  func.func @transform_12(%arg0: i32) -> (i32, i32) {
    %c0_i32 = arith.constant 0 : i32
    %c0_i32_0 = arith.constant 0 : i32
    %c0_i32_1 = arith.constant 0 : i32
    return %c0_i32, %c0_i32_0 : i32, i32
  }
  func.func @transform_13(%arg0: i32) -> (i32, i32) {
    %c0_i32 = arith.constant 0 : i32
    %c0_i32_0 = arith.constant 0 : i32
    %c0_i32_1 = arith.constant 0 : i32
    return %c0_i32, %c0_i32_0 : i32, i32
  }
  func.func @transform_14(%arg0: i32) -> (i32, i32, i32) {
    %c0_i32 = arith.constant 0 : i32
    %c0_i32_0 = arith.constant 0 : i32
    %c0_i32_1 = arith.constant 0 : i32
    return %arg0, %c0_i32, %c0_i32_0 : i32, i32, i32
  }
  func.func @transform_15(%arg0: i32) -> (i32, i32, i32) {
    %c0_i32 = arith.constant 0 : i32
    %c0_i32_0 = arith.constant 0 : i32
    %c0_i32_1 = arith.constant 0 : i32
    return %arg0, %c0_i32, %c0_i32_0 : i32, i32, i32
  }
}

module attributes {stable_mosaic.version = 11 : i64} {
  func.func @_inter_kernel(%arg0: i32, %arg1: memref<1x8x16xf32, #tpu.memory_space<vmem>>, %arg2: memref<1x8x256xf32, #tpu.memory_space<vmem>>, %arg3: memref<1x8x16xf32, #tpu.memory_space<vmem>>, %arg4: memref<8x8xf32, #tpu.memory_space<vmem>>, %arg5: memref<8x1xf32, #tpu.memory_space<vmem>>, %arg6: memref<16x48xf32, #tpu.memory_space<vmem>>, %arg7: memref<1x48xf32, #tpu.memory_space<vmem>>, %arg8: memref<16x48xf32, #tpu.memory_space<vmem>>, %arg9: memref<1x48xf32, #tpu.memory_space<vmem>>, %arg10: memref<272x16xf32, #tpu.memory_space<vmem>>, %arg11: memref<1x16xf32, #tpu.memory_space<vmem>>, %arg12: memref<32x16xf32, #tpu.memory_space<vmem>>, %arg13: memref<1x16xf32, #tpu.memory_space<vmem>>, %arg14: memref<1x8x16xf32, #tpu.memory_space<vmem>>, %arg15: memref<1x8x16xf32, #tpu.memory_space<vmem>>) attributes {dimension_semantics = [#tpu.dimension_semantics<parallel>], iteration_bounds = array<i64: 2>, scalar_prefetch = 0 : i64, scratch_operands = 0 : i64, tpu.core_type = #tpu.core_type<tc>, window_params = [{transform_indices = @transform_0, window_bounds = array<i64: 1, 8, 16>}, {transform_indices = @transform_1, window_bounds = array<i64: 1, 8, 256>}, {transform_indices = @transform_2, window_bounds = array<i64: 1, 8, 16>}, {pipeline_mode = #tpu.pipeline_mode<synchronous>, transform_indices = @transform_3, window_bounds = array<i64: 8, 8>}, {pipeline_mode = #tpu.pipeline_mode<synchronous>, transform_indices = @transform_4, window_bounds = array<i64: 8, 1>}, {pipeline_mode = #tpu.pipeline_mode<synchronous>, transform_indices = @transform_5, window_bounds = array<i64: 16, 48>}, {pipeline_mode = #tpu.pipeline_mode<synchronous>, transform_indices = @transform_6, window_bounds = array<i64: 1, 48>}, {pipeline_mode = #tpu.pipeline_mode<synchronous>, transform_indices = @transform_7, window_bounds = array<i64: 16, 48>}, {pipeline_mode = #tpu.pipeline_mode<synchronous>, transform_indices = @transform_8, window_bounds = array<i64: 1, 48>}, {pipeline_mode = #tpu.pipeline_mode<synchronous>, transform_indices = @transform_9, window_bounds = array<i64: 272, 16>}, {pipeline_mode = #tpu.pipeline_mode<synchronous>, transform_indices = @transform_10, window_bounds = array<i64: 1, 16>}, {pipeline_mode = #tpu.pipeline_mode<synchronous>, transform_indices = @transform_11, window_bounds = array<i64: 32, 16>}, {pipeline_mode = #tpu.pipeline_mode<synchronous>, transform_indices = @transform_12, window_bounds = array<i64: 1, 16>}, {transform_indices = @transform_13, window_bounds = array<i64: 1, 8, 16>}, {transform_indices = @transform_14, window_bounds = array<i64: 1, 8, 16>}]} {
    %c0 = arith.constant 0 : index
    %c0_0 = arith.constant 0 : index
    %c0_1 = arith.constant 0 : index
    %0 = vector.load %arg1[%c0, %c0_0, %c0_1] : memref<1x8x16xf32, #tpu.memory_space<vmem>>, vector<1x8x16xf32>
    %1 = vector.shape_cast %0 : vector<1x8x16xf32> to vector<8x16xf32>
    %c0_2 = arith.constant 0 : index
    %c0_3 = arith.constant 0 : index
    %c0_4 = arith.constant 0 : index
    %2 = vector.load %arg3[%c0_2, %c0_3, %c0_4] : memref<1x8x16xf32, #tpu.memory_space<vmem>>, vector<1x8x16xf32>
    %3 = vector.shape_cast %2 : vector<1x8x16xf32> to vector<8x16xf32>
    %c0_5 = arith.constant 0 : index
    %c0_6 = arith.constant 0 : index
    %4 = vector.load %arg4[%c0_5, %c0_6] : memref<8x8xf32, #tpu.memory_space<vmem>>, vector<8x8xf32>
    %cst = arith.constant dense<0.000000e+00> : vector<8x16xf32>
    %5 = tpu.matmul %4, %3, %cst {dimension_numbers = #tpu.dot_dimension_numbers<[1], [0], [0], [1], [0, 0, 1, 1], [], []>} : vector<8x8xf32>, vector<8x16xf32>, vector<8x16xf32> -> vector<8x16xf32>
    %c0_7 = arith.constant 0 : index
    %c0_8 = arith.constant 0 : index
    %6 = vector.load %arg5[%c0_7, %c0_8] : memref<8x1xf32, #tpu.memory_space<vmem>>, vector<8x1xf32>
    %7 = vector.broadcast %6 : vector<8x1xf32> to vector<8x16xf32>
    %8 = arith.addf %5, %7 : vector<8x16xf32>
    %cst_9 = arith.constant 0.000000e+00 : f32
    %9 = vector.broadcast %cst_9 : f32 to vector<8x16xf32>
    %10 = arith.maximumf %8, %9 : vector<8x16xf32>
    %cst_10 = arith.constant 0.000000e+00 : f32
    %11 = vector.broadcast %cst_10 : f32 to vector<8x16xf32>
    %12 = arith.maximumf %1, %11 : vector<8x16xf32>
    %c0_11 = arith.constant 0 : index
    %c0_12 = arith.constant 0 : index
    %13 = vector.load %arg6[%c0_11, %c0_12] : memref<16x48xf32, #tpu.memory_space<vmem>>, vector<16x48xf32>
    %cst_13 = arith.constant dense<0.000000e+00> : vector<8x48xf32>
    %14 = tpu.matmul %12, %13, %cst_13 {dimension_numbers = #tpu.dot_dimension_numbers<[1], [0], [0], [1], [0, 0, 1, 1], [], []>} : vector<8x16xf32>, vector<16x48xf32>, vector<8x48xf32> -> vector<8x48xf32>
    %c0_14 = arith.constant 0 : index
    %c0_15 = arith.constant 0 : index
    %15 = vector.load %arg7[%c0_14, %c0_15] : memref<1x48xf32, #tpu.memory_space<vmem>>, vector<1x48xf32>
    %16 = vector.broadcast %15 : vector<1x48xf32> to vector<8x48xf32>
    %17 = arith.addf %14, %16 : vector<8x48xf32>
    %cst_16 = arith.constant 0.000000e+00 : f32
    %18 = vector.broadcast %cst_16 : f32 to vector<8x16xf32>
    %19 = arith.maximumf %10, %18 : vector<8x16xf32>
    %c0_17 = arith.constant 0 : index
    %c0_18 = arith.constant 0 : index
    %20 = vector.load %arg8[%c0_17, %c0_18] : memref<16x48xf32, #tpu.memory_space<vmem>>, vector<16x48xf32>
    %cst_19 = arith.constant dense<0.000000e+00> : vector<8x48xf32>
    %21 = tpu.matmul %19, %20, %cst_19 {dimension_numbers = #tpu.dot_dimension_numbers<[1], [0], [0], [1], [0, 0, 1, 1], [], []>} : vector<8x16xf32>, vector<16x48xf32>, vector<8x48xf32> -> vector<8x48xf32>
    %c0_20 = arith.constant 0 : index
    %c0_21 = arith.constant 0 : index
    %22 = vector.load %arg9[%c0_20, %c0_21] : memref<1x48xf32, #tpu.memory_space<vmem>>, vector<1x48xf32>
    %23 = vector.broadcast %22 : vector<1x48xf32> to vector<8x48xf32>
    %24 = arith.addf %21, %23 : vector<8x48xf32>
    %25 = vector.extract_strided_slice %17 {offsets = [0, 0], sizes = [8, 16], strides = [1, 1]} : vector<8x48xf32> to vector<8x16xf32>
    %26 = vector.extract_strided_slice %17 {offsets = [0, 16], sizes = [8, 16], strides = [1, 1]} : vector<8x48xf32> to vector<8x16xf32>
    %27 = vector.extract_strided_slice %17 {offsets = [0, 32], sizes = [8, 16], strides = [1, 1]} : vector<8x48xf32> to vector<8x16xf32>
    %28 = vector.extract_strided_slice %24 {offsets = [0, 0], sizes = [8, 16], strides = [1, 1]} : vector<8x48xf32> to vector<8x16xf32>
    %29 = vector.extract_strided_slice %24 {offsets = [0, 16], sizes = [8, 16], strides = [1, 1]} : vector<8x48xf32> to vector<8x16xf32>
    %30 = vector.extract_strided_slice %24 {offsets = [0, 32], sizes = [8, 16], strides = [1, 1]} : vector<8x48xf32> to vector<8x16xf32>
    %31 = vector.extract_strided_slice %26 {offsets = [0, 0], sizes = [8, 8], strides = [1, 1]} : vector<8x16xf32> to vector<8x8xf32>
    %32 = vector.extract_strided_slice %28 {offsets = [0, 0], sizes = [8, 8], strides = [1, 1]} : vector<8x16xf32> to vector<8x8xf32>
    %33 = vector.extract_strided_slice %30 {offsets = [0, 0], sizes = [8, 8], strides = [1, 1]} : vector<8x16xf32> to vector<8x8xf32>
    %cst_22 = arith.constant dense<0.000000e+00> : vector<8x8xf32>
    %34 = tpu.matmul %31, %32, %cst_22 {dimension_numbers = #tpu.dot_dimension_numbers<[1], [1], [0], [0], [0, 0, 1, 0], [], []>} : vector<8x8xf32>, vector<8x8xf32>, vector<8x8xf32> -> vector<8x8xf32>
    %cst_23 = arith.constant 0.353553385 : f32
    %35 = vector.broadcast %cst_23 : f32 to vector<8x8xf32>
    %36 = arith.mulf %34, %35 : vector<8x8xf32>
    %cst_24 = arith.constant dense<0xFF800000> : vector<8xf32>
    %37 = vector.multi_reduction <maximumf>, %36, %cst_24 [1] : vector<8x8xf32> to vector<8xf32>
    %38 = vector.shape_cast %37 : vector<8xf32> to vector<8x1xf32>
    %39 = vector.broadcast %38 : vector<8x1xf32> to vector<8x8xf32>
    %40 = arith.subf %36, %39 : vector<8x8xf32>
    %41 = math.exp %40 : vector<8x8xf32>
    %cst_25 = arith.constant dense<0.000000e+00> : vector<8xf32>
    %42 = vector.multi_reduction <add>, %41, %cst_25 [1] : vector<8x8xf32> to vector<8xf32>
    %43 = vector.shape_cast %42 : vector<8xf32> to vector<8x1xf32>
    %44 = tpu.reciprocal %43 {approx = true} : vector<8x1xf32> -> vector<8x1xf32>
    %45 = vector.broadcast %44 : vector<8x1xf32> to vector<8x8xf32>
    %46 = arith.mulf %41, %45 : vector<8x8xf32>
    %cst_26 = arith.constant dense<0.000000e+00> : vector<8x8xf32>
    %47 = tpu.matmul %46, %33, %cst_26 {dimension_numbers = #tpu.dot_dimension_numbers<[1], [0], [0], [1], [0, 0, 1, 1], [], []>} : vector<8x8xf32>, vector<8x8xf32>, vector<8x8xf32> -> vector<8x8xf32>
    %48 = vector.extract_strided_slice %26 {offsets = [0, 8], sizes = [8, 8], strides = [1, 1]} : vector<8x16xf32> to vector<8x8xf32>
    %49 = vector.extract_strided_slice %28 {offsets = [0, 8], sizes = [8, 8], strides = [1, 1]} : vector<8x16xf32> to vector<8x8xf32>
    %50 = vector.extract_strided_slice %30 {offsets = [0, 8], sizes = [8, 8], strides = [1, 1]} : vector<8x16xf32> to vector<8x8xf32>
    %cst_27 = arith.constant dense<0.000000e+00> : vector<8x8xf32>
    %51 = tpu.matmul %48, %49, %cst_27 {dimension_numbers = #tpu.dot_dimension_numbers<[1], [1], [0], [0], [0, 0, 1, 0], [], []>} : vector<8x8xf32>, vector<8x8xf32>, vector<8x8xf32> -> vector<8x8xf32>
    %cst_28 = arith.constant 0.353553385 : f32
    %52 = vector.broadcast %cst_28 : f32 to vector<8x8xf32>
    %53 = arith.mulf %51, %52 : vector<8x8xf32>
    %cst_29 = arith.constant dense<0xFF800000> : vector<8xf32>
    %54 = vector.multi_reduction <maximumf>, %53, %cst_29 [1] : vector<8x8xf32> to vector<8xf32>
    %55 = vector.shape_cast %54 : vector<8xf32> to vector<8x1xf32>
    %56 = vector.broadcast %55 : vector<8x1xf32> to vector<8x8xf32>
    %57 = arith.subf %53, %56 : vector<8x8xf32>
    %58 = math.exp %57 : vector<8x8xf32>
    %cst_30 = arith.constant dense<0.000000e+00> : vector<8xf32>
    %59 = vector.multi_reduction <add>, %58, %cst_30 [1] : vector<8x8xf32> to vector<8xf32>
    %60 = vector.shape_cast %59 : vector<8xf32> to vector<8x1xf32>
    %61 = tpu.reciprocal %60 {approx = true} : vector<8x1xf32> -> vector<8x1xf32>
    %62 = vector.broadcast %61 : vector<8x1xf32> to vector<8x8xf32>
    %63 = arith.mulf %58, %62 : vector<8x8xf32>
    %cst_31 = arith.constant dense<0.000000e+00> : vector<8x8xf32>
    %64 = tpu.matmul %63, %50, %cst_31 {dimension_numbers = #tpu.dot_dimension_numbers<[1], [0], [0], [1], [0, 0, 1, 1], [], []>} : vector<8x8xf32>, vector<8x8xf32>, vector<8x8xf32> -> vector<8x8xf32>
    %65 = tpu.concatenate %47, %64 in 1 : vector<8x8xf32>, vector<8x8xf32> -> vector<8x16xf32>
    %66 = vector.extract_strided_slice %29 {offsets = [0, 0], sizes = [8, 8], strides = [1, 1]} : vector<8x16xf32> to vector<8x8xf32>
    %67 = vector.extract_strided_slice %25 {offsets = [0, 0], sizes = [8, 8], strides = [1, 1]} : vector<8x16xf32> to vector<8x8xf32>
    %68 = vector.extract_strided_slice %27 {offsets = [0, 0], sizes = [8, 8], strides = [1, 1]} : vector<8x16xf32> to vector<8x8xf32>
    %cst_32 = arith.constant dense<0.000000e+00> : vector<8x8xf32>
    %69 = tpu.matmul %66, %67, %cst_32 {dimension_numbers = #tpu.dot_dimension_numbers<[1], [1], [0], [0], [0, 0, 1, 0], [], []>} : vector<8x8xf32>, vector<8x8xf32>, vector<8x8xf32> -> vector<8x8xf32>
    %cst_33 = arith.constant 0.353553385 : f32
    %70 = vector.broadcast %cst_33 : f32 to vector<8x8xf32>
    %71 = arith.mulf %69, %70 : vector<8x8xf32>
    %cst_34 = arith.constant dense<0xFF800000> : vector<8xf32>
    %72 = vector.multi_reduction <maximumf>, %71, %cst_34 [1] : vector<8x8xf32> to vector<8xf32>
    %73 = vector.shape_cast %72 : vector<8xf32> to vector<8x1xf32>
    %74 = vector.broadcast %73 : vector<8x1xf32> to vector<8x8xf32>
    %75 = arith.subf %71, %74 : vector<8x8xf32>
    %76 = math.exp %75 : vector<8x8xf32>
    %cst_35 = arith.constant dense<0.000000e+00> : vector<8xf32>
    %77 = vector.multi_reduction <add>, %76, %cst_35 [1] : vector<8x8xf32> to vector<8xf32>
    %78 = vector.shape_cast %77 : vector<8xf32> to vector<8x1xf32>
    %79 = tpu.reciprocal %78 {approx = true} : vector<8x1xf32> -> vector<8x1xf32>
    %80 = vector.broadcast %79 : vector<8x1xf32> to vector<8x8xf32>
    %81 = arith.mulf %76, %80 : vector<8x8xf32>
    %cst_36 = arith.constant dense<0.000000e+00> : vector<8x8xf32>
    %82 = tpu.matmul %81, %68, %cst_36 {dimension_numbers = #tpu.dot_dimension_numbers<[1], [0], [0], [1], [0, 0, 1, 1], [], []>} : vector<8x8xf32>, vector<8x8xf32>, vector<8x8xf32> -> vector<8x8xf32>
    %83 = vector.extract_strided_slice %29 {offsets = [0, 8], sizes = [8, 8], strides = [1, 1]} : vector<8x16xf32> to vector<8x8xf32>
    %84 = vector.extract_strided_slice %25 {offsets = [0, 8], sizes = [8, 8], strides = [1, 1]} : vector<8x16xf32> to vector<8x8xf32>
    %85 = vector.extract_strided_slice %27 {offsets = [0, 8], sizes = [8, 8], strides = [1, 1]} : vector<8x16xf32> to vector<8x8xf32>
    %cst_37 = arith.constant dense<0.000000e+00> : vector<8x8xf32>
    %86 = tpu.matmul %83, %84, %cst_37 {dimension_numbers = #tpu.dot_dimension_numbers<[1], [1], [0], [0], [0, 0, 1, 0], [], []>} : vector<8x8xf32>, vector<8x8xf32>, vector<8x8xf32> -> vector<8x8xf32>
    %cst_38 = arith.constant 0.353553385 : f32
    %87 = vector.broadcast %cst_38 : f32 to vector<8x8xf32>
    %88 = arith.mulf %86, %87 : vector<8x8xf32>
    %cst_39 = arith.constant dense<0xFF800000> : vector<8xf32>
    %89 = vector.multi_reduction <maximumf>, %88, %cst_39 [1] : vector<8x8xf32> to vector<8xf32>
    %90 = vector.shape_cast %89 : vector<8xf32> to vector<8x1xf32>
    %91 = vector.broadcast %90 : vector<8x1xf32> to vector<8x8xf32>
    %92 = arith.subf %88, %91 : vector<8x8xf32>
    %93 = math.exp %92 : vector<8x8xf32>
    %cst_40 = arith.constant dense<0.000000e+00> : vector<8xf32>
    %94 = vector.multi_reduction <add>, %93, %cst_40 [1] : vector<8x8xf32> to vector<8xf32>
    %95 = vector.shape_cast %94 : vector<8xf32> to vector<8x1xf32>
    %96 = tpu.reciprocal %95 {approx = true} : vector<8x1xf32> -> vector<8x1xf32>
    %97 = vector.broadcast %96 : vector<8x1xf32> to vector<8x8xf32>
    %98 = arith.mulf %93, %97 : vector<8x8xf32>
    %cst_41 = arith.constant dense<0.000000e+00> : vector<8x8xf32>
    %99 = tpu.matmul %98, %85, %cst_41 {dimension_numbers = #tpu.dot_dimension_numbers<[1], [0], [0], [1], [0, 0, 1, 1], [], []>} : vector<8x8xf32>, vector<8x8xf32>, vector<8x8xf32> -> vector<8x8xf32>
    %100 = tpu.concatenate %82, %99 in 1 : vector<8x8xf32>, vector<8x8xf32> -> vector<8x16xf32>
    %c0_42 = arith.constant 0 : index
    %c0_43 = arith.constant 0 : index
    %101 = vector.load %arg10[%c0_42, %c0_43] : memref<272x16xf32, #tpu.memory_space<vmem>>, vector<272x16xf32>
    %c0_44 = arith.constant 0 : index
    %c0_45 = arith.constant 0 : index
    %102 = vector.load %arg12[%c0_44, %c0_45] : memref<32x16xf32, #tpu.memory_space<vmem>>, vector<32x16xf32>
    %c0_46 = arith.constant 0 : index
    %c0_47 = arith.constant 0 : index
    %c0_48 = arith.constant 0 : index
    %103 = vector.load %arg2[%c0_46, %c0_47, %c0_48] : memref<1x8x256xf32, #tpu.memory_space<vmem>>, vector<1x8x256xf32>
    %104 = vector.shape_cast %103 : vector<1x8x256xf32> to vector<8x256xf32>
    %105 = vector.extract_strided_slice %101 {offsets = [0, 0], sizes = [256, 16], strides = [1, 1]} : vector<272x16xf32> to vector<256x16xf32>
    %cst_49 = arith.constant dense<0.000000e+00> : vector<8x16xf32>
    %106 = tpu.matmul %104, %105, %cst_49 {dimension_numbers = #tpu.dot_dimension_numbers<[1], [0], [0], [1], [0, 0, 1, 1], [], []>} : vector<8x256xf32>, vector<256x16xf32>, vector<8x16xf32> -> vector<8x16xf32>
    %107 = vector.extract_strided_slice %101 {offsets = [256, 0], sizes = [16, 16], strides = [1, 1]} : vector<272x16xf32> to vector<16x16xf32>
    %cst_50 = arith.constant dense<0.000000e+00> : vector<8x16xf32>
    %108 = tpu.matmul %65, %107, %cst_50 {dimension_numbers = #tpu.dot_dimension_numbers<[1], [0], [0], [1], [0, 0, 1, 1], [], []>} : vector<8x16xf32>, vector<16x16xf32>, vector<8x16xf32> -> vector<8x16xf32>
    %109 = arith.addf %106, %108 : vector<8x16xf32>
    %c0_51 = arith.constant 0 : index
    %c0_52 = arith.constant 0 : index
    %110 = vector.load %arg11[%c0_51, %c0_52] : memref<1x16xf32, #tpu.memory_space<vmem>>, vector<1x16xf32>
    %111 = vector.broadcast %110 : vector<1x16xf32> to vector<8x16xf32>
    %112 = arith.addf %109, %111 : vector<8x16xf32>
    %c0_53 = arith.constant 0 : index
    %c0_54 = arith.constant 0 : index
    %c0_55 = arith.constant 0 : index
    %113 = vector.load %arg14[%c0_53, %c0_54, %c0_55] : memref<1x8x16xf32, #tpu.memory_space<vmem>>, vector<1x8x16xf32>
    %114 = vector.shape_cast %113 : vector<1x8x16xf32> to vector<8x16xf32>
    %115 = vector.shape_cast %112 : vector<8x16xf32> to vector<1x8x16xf32>
    tpu.vector_store %arg14[%c0_53, %c0_54, %c0_55], %115 {strides = array<i32>} : memref<1x8x16xf32, #tpu.memory_space<vmem>>, vector<1x8x16xf32>,
    %116 = vector.extract_strided_slice %102 {offsets = [0, 0], sizes = [16, 16], strides = [1, 1]} : vector<32x16xf32> to vector<16x16xf32>
    %cst_56 = arith.constant dense<0.000000e+00> : vector<8x16xf32>
    %117 = tpu.matmul %3, %116, %cst_56 {dimension_numbers = #tpu.dot_dimension_numbers<[1], [0], [0], [1], [0, 0, 1, 1], [], []>} : vector<8x16xf32>, vector<16x16xf32>, vector<8x16xf32> -> vector<8x16xf32>
    %118 = vector.extract_strided_slice %102 {offsets = [16, 0], sizes = [16, 16], strides = [1, 1]} : vector<32x16xf32> to vector<16x16xf32>
    %cst_57 = arith.constant dense<0.000000e+00> : vector<8x16xf32>
    %119 = tpu.matmul %100, %118, %cst_57 {dimension_numbers = #tpu.dot_dimension_numbers<[1], [0], [0], [1], [0, 0, 1, 1], [], []>} : vector<8x16xf32>, vector<16x16xf32>, vector<8x16xf32> -> vector<8x16xf32>
    %120 = arith.addf %117, %119 : vector<8x16xf32>
    %c0_58 = arith.constant 0 : index
    %c0_59 = arith.constant 0 : index
    %121 = vector.load %arg13[%c0_58, %c0_59] : memref<1x16xf32, #tpu.memory_space<vmem>>, vector<1x16xf32>
    %122 = vector.broadcast %121 : vector<1x16xf32> to vector<8x16xf32>
    %123 = arith.addf %120, %122 : vector<8x16xf32>
    %c0_60 = arith.constant 0 : index
    %c0_61 = arith.constant 0 : index
    %c0_62 = arith.constant 0 : index
    %124 = vector.load %arg15[%c0_60, %c0_61, %c0_62] : memref<1x8x16xf32, #tpu.memory_space<vmem>>, vector<1x8x16xf32>
    %125 = vector.shape_cast %124 : vector<1x8x16xf32> to vector<8x16xf32>
    %126 = vector.shape_cast %123 : vector<8x16xf32> to vector<1x8x16xf32>
    tpu.vector_store %arg15[%c0_60, %c0_61, %c0_62], %126 {strides = array<i32>} : memref<1x8x16xf32, #tpu.memory_space<vmem>>, vector<1x8x16xf32>,
    return
  }
  func.func @transform_0(%arg0: i32) -> (i32, i32, i32) {
    %c0_i32 = arith.constant 0 : i32
    %c0_i32_0 = arith.constant 0 : i32
    %c0_i32_1 = arith.constant 0 : i32
    return %arg0, %c0_i32, %c0_i32_0 : i32, i32, i32
  }
  func.func @transform_1(%arg0: i32) -> (i32, i32, i32) {
    %c0_i32 = arith.constant 0 : i32
    %c0_i32_0 = arith.constant 0 : i32
    %c0_i32_1 = arith.constant 0 : i32
    return %arg0, %c0_i32, %c0_i32_0 : i32, i32, i32
  }
  func.func @transform_2(%arg0: i32) -> (i32, i32, i32) {
    %c0_i32 = arith.constant 0 : i32
    %c0_i32_0 = arith.constant 0 : i32
    %c0_i32_1 = arith.constant 0 : i32
    return %arg0, %c0_i32, %c0_i32_0 : i32, i32, i32
  }
  func.func @transform_3(%arg0: i32) -> (i32, i32) {
    %c0_i32 = arith.constant 0 : i32
    %c0_i32_0 = arith.constant 0 : i32
    %c0_i32_1 = arith.constant 0 : i32
    return %c0_i32, %c0_i32_0 : i32, i32
  }
  func.func @transform_4(%arg0: i32) -> (i32, i32) {
    %c0_i32 = arith.constant 0 : i32
    %c0_i32_0 = arith.constant 0 : i32
    %c0_i32_1 = arith.constant 0 : i32
    return %c0_i32, %c0_i32_0 : i32, i32
  }
  func.func @transform_5(%arg0: i32) -> (i32, i32) {
    %c0_i32 = arith.constant 0 : i32
    %c0_i32_0 = arith.constant 0 : i32
    %c0_i32_1 = arith.constant 0 : i32
    return %c0_i32, %c0_i32_0 : i32, i32
  }
  func.func @transform_6(%arg0: i32) -> (i32, i32) {
    %c0_i32 = arith.constant 0 : i32
    %c0_i32_0 = arith.constant 0 : i32
    %c0_i32_1 = arith.constant 0 : i32
    return %c0_i32, %c0_i32_0 : i32, i32
  }
  func.func @transform_7(%arg0: i32) -> (i32, i32) {
    %c0_i32 = arith.constant 0 : i32
    %c0_i32_0 = arith.constant 0 : i32
    %c0_i32_1 = arith.constant 0 : i32
    return %c0_i32, %c0_i32_0 : i32, i32
  }
  func.func @transform_8(%arg0: i32) -> (i32, i32) {
    %c0_i32 = arith.constant 0 : i32
    %c0_i32_0 = arith.constant 0 : i32
    %c0_i32_1 = arith.constant 0 : i32
    return %c0_i32, %c0_i32_0 : i32, i32
  }
  func.func @transform_9(%arg0: i32) -> (i32, i32) {
    %c0_i32 = arith.constant 0 : i32
    %c0_i32_0 = arith.constant 0 : i32
    %c0_i32_1 = arith.constant 0 : i32
    return %c0_i32, %c0_i32_0 : i32, i32
  }
  func.func @transform_10(%arg0: i32) -> (i32, i32) {
    %c0_i32 = arith.constant 0 : i32
    %c0_i32_0 = arith.constant 0 : i32
    %c0_i32_1 = arith.constant 0 : i32
    return %c0_i32, %c0_i32_0 : i32, i32
  }
  func.func @transform_11(%arg0: i32) -> (i32, i32) {
    %c0_i32 = arith.constant 0 : i32
    %c0_i32_0 = arith.constant 0 : i32
    %c0_i32_1 = arith.constant 0 : i32
    return %c0_i32, %c0_i32_0 : i32, i32
  }
  func.func @transform_12(%arg0: i32) -> (i32, i32) {
    %c0_i32 = arith.constant 0 : i32
    %c0_i32_0 = arith.constant 0 : i32
    %c0_i32_1 = arith.constant 0 : i32
    return %c0_i32, %c0_i32_0 : i32, i32
  }
  func.func @transform_13(%arg0: i32) -> (i32, i32, i32) {
    %c0_i32 = arith.constant 0 : i32
    %c0_i32_0 = arith.constant 0 : i32
    %c0_i32_1 = arith.constant 0 : i32
    return %arg0, %c0_i32, %c0_i32_0 : i32, i32, i32
  }
  func.func @transform_14(%arg0: i32) -> (i32, i32, i32) {
    %c0_i32 = arith.constant 0 : i32
    %c0_i32_0 = arith.constant 0 : i32
    %c0_i32_1 = arith.constant 0 : i32
    return %arg0, %c0_i32, %c0_i32_0 : i32, i32, i32
  }
}

</mosaic_0001>

<bundles_post_ra>
// kernel: multiblock_forward.4
= control target key start
LH: loop header
LB: loop body
LE: loop exit
PB: predicated region body
PF: predicated region fallthrough
CT: control target
= control target key end

     0   :  { %s618_s12 = smov 0   ;;  %s727_s0 = inlined_call_operand.vmem [shape: f32[2,64,128], index: 0, kind: input, shape index: {}]   ;;  %s728_s1 = inlined_call_operand.vmem [shape: f32[128,8], index: 1, kind: input, shape index: {}]   ;;  %s729_s2 = inlined_call_operand.vmem [shape: f32[1,8], index: 2, kind: input, shape index: {}]   ;;  %s730_s3 = inlined_call_operand.vmem [shape: f32[2,64,8], index: 3, kind: output, shape index: {}]  }
   0x1 LB: > { %s450_s13 = sadd.s32 4294967295, %s596_s12   ;;  %p454_p0 = scmp.ge.s32.totalorder %s596_s12, 1  ;;  %s596_s12 = sphi %s618_s12, %s13_s12  }
   0x2   : > { %p137_p1 = scmp.lt.s32.totalorder %s596_s12, 3 }
   0x4   : > { %p138_p2 = pnand %p454_p0, %p137_p1 }
   0x5   : > { %v179_v0 = vld [vmem:[%s728_s1] sm:$0xff] (!%p138_p2)  ;;  %v180_v1 = vld [vmem:[%s728_s1 + $0x8] sm:$0xff] (!%p138_p2)  ;;  %v181_v2 = vld [vmem:[%s728_s1 + $0x10] sm:$0xff] (!%p138_p2)  ;;  %p161_p3 = scmp.lt.s32.totalorder (!%p138_p2), %s450_s13, 1  ;;  %vm307_vm0 = vcmask (!%p138_p2), 64512  }
   0x6   : > { %141 = sbr.rel (%p138_p2) target bundleno = 340 (0x154), region = 32  ;;  %v532_v3 = vpack.c.bf16 (!%p138_p2), %v180_v1, %v179_v0  ;;  %v182_v4 = vld [vmem:[%s728_s1 + $0x18] sm:$0xff] (!%p138_p2)  ;;  %v183_v6 = vld [vmem:[%s728_s1 + $0x20] sm:$0xff] (!%p138_p2)  ;;  %v184_v7 = vld [vmem:[%s728_s1 + $0x28] sm:$0xff] (!%p138_p2) }
   0x7   : > { %v536_v5 = vpack.c.bf16 (!%p138_p2), %v182_v4, %v181_v2  ;;  %v540_v8 = vpack.c.bf16 (!%p138_p2), %v184_v7, %v183_v6  ;;  %v185_v9 = vld [vmem:[%s728_s1 + $0x30] sm:$0xff] (!%p138_p2)  ;;  %v186_v10 = vld [vmem:[%s728_s1 + $0x38] sm:$0xff] (!%p138_p2)  ;;  %v187_v14 = vld [vmem:[%s728_s1 + $0x40] sm:$0xff] (!%p138_p2) }
   0x8   : > { %533 = vmatprep.subr.bf16.mxu0 (!%p138_p2), %v532_v3  ;;  %564 = vmatprep.subr.bf16.mxu1 (!%p138_p2), %v532_v3  ;;  %v544_v13 = vpack.c.bf16 (!%p138_p2), %v186_v10, %v185_v9  ;;  %v188_v15 = vld [vmem:[%s728_s1 + $0x48] sm:$0xff] (!%p138_p2)  ;;  %v189_v17 = vld [vmem:[%s728_s1 + $0x50] sm:$0xff] (!%p138_p2)  ;;  %v190_v18 = vld [vmem:[%s728_s1 + $0x58] sm:$0xff] (!%p138_p2) }
   0x9   : > { %535 = vmatpush3.bf16.msra.mxu0 (!%p138_p2), %v532_v3  ;;  %572 = vmatpush3.bf16.msra.mxu1 (!%p138_p2), %v532_v3  ;;  %v548_v16 = vpack.c.bf16 (!%p138_p2), %v188_v15, %v187_v14  ;;  %v552_v19 = vpack.c.bf16 (!%p138_p2), %v190_v18, %v189_v17  ;;  %v191_v20 = vld [vmem:[%s728_s1 + $0x60] sm:$0xff] (!%p138_p2)  ;;  %v192_v21 = vld [vmem:[%s728_s1 + $0x68] sm:$0xff] (!%p138_p2)  ;;  %v193_v23 = vld [vmem:[%s728_s1 + $0x70] sm:$0xff] (!%p138_p2) }
   0xa   : > { %537 = vmatprep.subr.bf16.mxu0 (!%p138_p2), %v536_v5  ;;  %565 = vmatprep.subr.bf16.mxu1 (!%p138_p2), %v536_v5  ;;  %v556_v22 = vpack.c.bf16 (!%p138_p2), %v192_v21, %v191_v20  ;;  %v194_v24 = vld [vmem:[%s728_s1 + $0x78] sm:$0xff] (!%p138_p2)  ;;  %v459_v32 = vld [vmem:[%s729_s2] ss:$0 sm:$0xff] (!%p138_p2) }
   0xb   : > { %v560_v25 = vpack.c.bf16 (!%p138_p2), %v194_v24, %v193_v23 }
   0xd   : > { %s732_s13 = smov (!%p161_p3, %s450_s13), 1  ;;  %539 = vmatpush3.bf16.msra.mxu0 %v536_v5  ;;  %573 = vmatpush3.bf16.msra.mxu1 %v536_v5 }
   0xe   : > { %s462_s26 = sshll.u32 %s732_s13, 6  ;;  %541 = vmatprep.subr.bf16.mxu0 %v540_v8  ;;  %566 = vmatprep.subr.bf16.mxu1 %v540_v8 }
   0xf   : > { %s652_s29 = scalar_lea.vmem %s727_s0, %s462_s26  ;;  %s170_s30 = scalar_lea.vmem %s730_s3, %s462_s26 }
  0x10   : > { %v171_v11 = vld [vmem:[%s652_s29] sm:$0xff]  ;;  %v172_v26 = vld [vmem:[%s652_s29 + $0x8] sm:$0xff]  ;;  %v173_v28 = vld [vmem:[%s652_s29 + $0x10] sm:$0xff] }
  0x11   : > { %520 = vmatprep.mubr.f32.mxu0 %v171_v11  ;;  %v175_v12 = vld [vmem:[%s652_s29 + $0x20] sm:$0xff]  ;;  %543 = vmatpush3.bf16.msra.mxu0 %v540_v8  ;;  %v176_v27 = vld [vmem:[%s652_s29 + $0x28] sm:$0xff]  ;;  %v177_v29 = vld [vmem:[%s652_s29 + $0x30] sm:$0xff] }
  0x12   : > { %526 = vmatprep.mubr.f32.mxu1 %v175_v12  ;;  %574 = vmatpush3.bf16.msra.mxu1 %v540_v8  ;;  %v174_v30 = vld [vmem:[%s652_s29 + $0x18] sm:$0xff] }
  0x13   : > { %545 = vmatprep.subr.bf16.mxu0 %v544_v13  ;;  %567 = vmatprep.subr.bf16.mxu1 %v544_v13  ;;  %v178_v31 = vld [vmem:[%s652_s29 + $0x38] sm:$0xff] }
  0x15   : > { %547 = vmatpush3.bf16.msra.mxu0 %v544_v13 }
  0x16   : > { %575 = vmatpush3.bf16.msra.mxu1 %v544_v13  ;;  %549 = vmatprep.subr.bf16.mxu0 %v548_v16 }
  0x17   : > { %568 = vmatprep.subr.bf16.mxu1 %v548_v16 }
  0x19   : > { %551 = vmatpush3.bf16.msra.mxu0 %v548_v16 }
  0x1a   : > { %576 = vmatpush3.bf16.msra.mxu1 %v548_v16  ;;  %553 = vmatprep.subr.bf16.mxu0 %v552_v19 }
  0x1b   : > { %569 = vmatprep.subr.bf16.mxu1 %v552_v19 }
  0x1d   : > { %555 = vmatpush3.bf16.msra.mxu0 %v552_v19 }
  0x1e   : > { %577 = vmatpush3.bf16.msra.mxu1 %v552_v19  ;;  %557 = vmatprep.subr.bf16.mxu0 %v556_v22 }
  0x1f   : > { %570 = vmatprep.subr.bf16.mxu1 %v556_v22 }
  0x21   : > { %559 = vmatpush3.bf16.msra.mxu0 %v556_v22 }
  0x22   : > { %578 = vmatpush3.bf16.msra.mxu1 %v556_v22  ;;  %561 = vmatprep.subr.bf16.mxu0 %v560_v25 }
  0x23   : > { %571 = vmatprep.subr.bf16.mxu1 %v560_v25 }
  0x25   : > { %563 = vmatpush3.bf16.msra.mxu0 %v560_v25 }
  0x26   : > { %579 = vmatpush3.bf16.msra.mxu1 %v560_v25 }
  0x28   : > { %521 = vmatmul.mubr.f32.vlgmr.msra.gmra.mrb[0].mxu0 %v172_v26 }
  0x29   : > { %527 = vmatmul.mubr.f32.vlgmr.msra.gmra.mrb[0].mxu1 %v176_v27  ;;  %523 = vmatprep.mubr.f32.mxu0 %v173_v28 }
  0x2a   : > { %529 = vmatprep.mubr.f32.mxu1 %v177_v29 }
  0x2c   : > { %524 = vmatmul.mubr.f32.gmra.mrb[2].mxu0 %v174_v30 }
  0x2d   : > { %530 = vmatmul.mubr.f32.gmra.mrb[2].mxu1 %v178_v31 }
  0xfb   : > { %v522_v33 = vpop.f32.mrb[0].mxu0 }
  0xfc   : > { %v528_v34 = vpop.f32.mrb[0].mxu1  ;;  %v274_v35 = vadd.f32 %v522_v33, %v459_v32  ;;  %v268_v36 = vpop.f32.mrb[1].mxu0 }
  0xfd   : > { %v288_v37 = vpop.f32.mrb[1].mxu1  ;;  %v269_v38 = vadd.f32 %v459_v32, %v268_v36  ;;  %v294_v52 = vadd.f32 %v528_v34, %v459_v32 }
  0xfe   : > { %v309_v39 = vsel %vm307_vm0, %v274_v35, 0.0  ;;  %v289_v48 = vadd.f32 %v459_v32, %v288_v37 }
  0xff   : > { %v308_v40 = vsel %vm307_vm0, %v269_v38, 0.0  ;;  %v525_v41 = vpop.f32.mrb[2].mxu0  ;;  %v317_v57 = vsel %vm307_vm0, %v294_v52, 0.0 }
 0x100   : > { %v531_v42 = vpop.f32.mrb[2].mxu1  ;;  %v310_v43 = vadd.f32 %v309_v39, %v308_v40  ;;  %v278_v44 = vpop.f32.mrb[3].mxu0  ;;  %v284_v46 = vadd.f32 %v525_v41, %v459_v32  ;;  %v315_v53 = vsel %vm307_vm0, %v289_v48, 0.0 }
 0x101   : > { %v298_v45 = vpop.f32.mrb[3].mxu1  ;;  %v279_v47 = vadd.f32 %v459_v32, %v278_v44  ;;  %v304_v58 = vadd.f32 %v531_v42, %v459_v32 }
 0x102   : > { %v313_v51 = vsel %vm307_vm0, %v284_v46, 0.0  ;;  %v299_v54 = vadd.f32 %v459_v32, %v298_v45 }
 0x103   : > { %v311_v49 = vsel %vm307_vm0, %v279_v47, 0.0  ;;  %v321_v62 = vsel %vm307_vm0, %v304_v58, 0.0 }
 0x104   : > { %v312_v50 = vadd.f32 %v311_v49, %v310_v43  ;;  %v319_v59 = vsel %vm307_vm0, %v299_v54, 0.0 }
 0x106   : > { %v314_v55 = vadd.f32 %v313_v51, %v312_v50 }
 0x108   : > { %v316_v56 = vadd.f32 %v315_v53, %v314_v55 }
 0x10a   : > { %v318_v60 = vadd.f32 %v317_v57, %v316_v56 }
 0x10c   : > { %v320_v61 = vadd.f32 %v319_v59, %v318_v60 }
 0x10e   : > { %v322_v63 = vadd.f32 %v321_v62, %v320_v61 }
 0x110   : > { %v323_v0 = vrot.slane %v322_v63, 4 }
 0x112   : > { %v324_v1 = vadd.f32 %v323_v0, %v322_v63 }
 0x114   : > { %v325_v2 = vrot.slane %v324_v1, 2 }
 0x116   : > { %v326_v3 = vadd.f32 %v325_v2, %v324_v1 }
 0x118   : > { %v327_v4 = vrot.slane %v326_v3, 1 }
 0x11a   : > { %v328_v5 = vadd.f32 %v327_v4, %v326_v3 }
 0x11c   : > { %v330_v6 = vmul.f32 0.015625, %v328_v5 }
 0x11e   : > { %v331_v7 = vsub.f32 %v269_v38, %v330_v6  ;;  %v332_v8 = vsub.f32 %v274_v35, %v330_v6  ;;  %v333_v9 = vsub.f32 %v279_v47, %v330_v6  ;;  %v334_v10 = vsub.f32 %v284_v46, %v330_v6 }
 0x11f   : > { %v335_v11 = vsub.f32 %v289_v48, %v330_v6  ;;  %v336_v12 = vsub.f32 %v294_v52, %v330_v6  ;;  %v337_v13 = vsub.f32 %v299_v54, %v330_v6  ;;  %v338_v14 = vsub.f32 %v304_v58, %v330_v6 }
 0x120   : > { %v339_v15 = vmul.f32 %v331_v7, %v331_v7  ;;  %v340_v16 = vmul.f32 %v332_v8, %v332_v8  ;;  %v341_v17 = vmul.f32 %v333_v9, %v333_v9  ;;  %v342_v18 = vmul.f32 %v334_v10, %v334_v10 }
 0x121   : > { %v343_v22 = vmul.f32 %v335_v11, %v335_v11  ;;  %v344_v25 = vmul.f32 %v336_v12, %v336_v12  ;;  %v345_v28 = vmul.f32 %v337_v13, %v337_v13  ;;  %v346_v31 = vmul.f32 %v338_v14, %v338_v14 }
 0x122   : > { %v347_v19 = vsel %vm307_vm0, %v339_v15, 0.0  ;;  %v348_v20 = vsel %vm307_vm0, %v340_v16, 0.0  ;;  %v350_v23 = vsel %vm307_vm0, %v341_v17, 0.0  ;;  %v352_v26 = vsel %vm307_vm0, %v342_v18, 0.0 }
 0x123   : > { %v349_v21 = vadd.f32 %v348_v20, %v347_v19  ;;  %v354_v29 = vsel %vm307_vm0, %v343_v22, 0.0  ;;  %v356_v32 = vsel %vm307_vm0, %v344_v25, 0.0  ;;  %v358_v34 = vsel %vm307_vm0, %v345_v28, 0.0 }
 0x124   : > { %v360_v36 = vsel %vm307_vm0, %v346_v31, 0.0 }
 0x125   : > { %v351_v24 = vadd.f32 %v350_v23, %v349_v21 }
 0x127   : > { %v353_v27 = vadd.f32 %v352_v26, %v351_v24 }
 0x129   : > { %v355_v30 = vadd.f32 %v354_v29, %v353_v27 }
 0x12b   : > { %v357_v33 = vadd.f32 %v356_v32, %v355_v30 }
 0x12d   : > { %v359_v35 = vadd.f32 %v358_v34, %v357_v33 }
 0x12f   : > { %v361_v37 = vadd.f32 %v360_v36, %v359_v35 }
 0x131   : > { %v362_v38 = vrot.slane %v361_v37, 4 }
 0x133   : > { %v363_v39 = vadd.f32 %v362_v38, %v361_v37 }
 0x135   : > { %v364_v40 = vrot.slane %v363_v39, 2 }
 0x137   : > { %v365_v41 = vadd.f32 %v364_v40, %v363_v39 }
 0x139   : > { %v366_v42 = vrot.slane %v365_v41, 1 }
 0x13b   : > { %v367_v43 = vadd.f32 %v366_v42, %v365_v41 }
 0x13d   : > { %v368_v44 = vmul.f32 0.015625, %v367_v43 }
 0x13f   : > { %v369_v45 = vadd.f32 1e-05, %v368_v44 }
 0x141   : > { %588 = vrsqrt.f32 %v369_v45 }
 0x14b   : > { %v589_v46 = vpop.eup %588 }
 0x14c   : > { %v371_v47 = vmul.f32 %v589_v46, %v331_v7  ;;  %v372_v48 = vmul.f32 %v589_v46, %v332_v8  ;;  %v373_v49 = vmul.f32 %v589_v46, %v333_v9  ;;  %v374_v50 = vmul.f32 %v589_v46, %v334_v10 }
 0x14d   : > { %v375_v51 = vmul.f32 %v589_v46, %v335_v11  ;;  %v376_v52 = vmul.f32 %v589_v46, %v336_v12  ;;  %v377_v53 = vmul.f32 %v589_v46, %v337_v13  ;;  %v378_v54 = vmul.f32 %v589_v46, %v338_v14 }
 0x14e   : > { %v379_v55 = vmax.f32 %v371_v47, 0.0  ;;  %v380_v56 = vmax.f32 %v372_v48, 0.0  ;;  %v381_v57 = vmax.f32 %v373_v49, 0.0  ;;  %v382_v58 = vmax.f32 %v374_v50, 0.0 }
 0x14f   : > { %v383_v59 = vmax.f32 %v375_v51, 0.0  ;;  %v384_v60 = vmax.f32 %v376_v52, 0.0  ;;  %v385_v61 = vmax.f32 %v377_v53, 0.0  ;;  %v386_v62 = vmax.f32 %v378_v54, 0.0 }
 0x150   : > { %387 = vst.msk [vmem:[%s170_s30] sm:$0xff] %vm307_vm0, %v379_v55  ;;  %388 = vst.msk [vmem:[%s170_s30 + $0x8] sm:$0xff] %vm307_vm0, %v380_v56 }
 0x151   : > { %389 = vst.msk [vmem:[%s170_s30 + $0x10] sm:$0xff] %vm307_vm0, %v381_v57  ;;  %390 = vst.msk [vmem:[%s170_s30 + $0x18] sm:$0xff] %vm307_vm0, %v382_v58 }
 0x152   : > { %391 = vst.msk [vmem:[%s170_s30 + $0x20] sm:$0xff] %vm307_vm0, %v383_v59  ;;  %392 = vst.msk [vmem:[%s170_s30 + $0x28] sm:$0xff] %vm307_vm0, %v384_v60 }
 0x153   : > { %393 = vst.msk [vmem:[%s170_s30 + $0x30] sm:$0xff] %vm307_vm0, %v385_v61  ;;  %394 = vst.msk [vmem:[%s170_s30 + $0x38] sm:$0xff] %vm307_vm0, %v386_v62 }
 0x154 PF: > { %s13_s12 = sadd.s32 1, %s596_s12  }
 0x155   : > { %p10_p4 = scmp.ge.s32.totalorder %s13_s12, 4  }
 0x157   :  { %12 = sbr.rel (!%p10_p4) target bundleno = 1 (0x1), region = 62 }

// kernel: multiblock_forward.5
= control target key start
LH: loop header
LB: loop body
LE: loop exit
PB: predicated region body
PF: predicated region fallthrough
CT: control target
= control target key end

     0   :  { %s497_s12 = smov 0   ;;  %s582_s0 = inlined_call_operand.vmem [shape: f32[2,16,128], index: 0, kind: input, shape index: {}]   ;;  %s583_s1 = inlined_call_operand.vmem [shape: f32[128,8], index: 1, kind: input, shape index: {}]   ;;  %s584_s2 = inlined_call_operand.vmem [shape: f32[1,8], index: 2, kind: input, shape index: {}]   ;;  %s585_s3 = inlined_call_operand.vmem [shape: f32[2,16,8], index: 3, kind: output, shape index: {}]  }
   0x1 LB: > { %s360_s13 = sadd.s32 4294967295, %s475_s12   ;;  %p364_p0 = scmp.ge.s32.totalorder %s475_s12, 1  ;;  %s475_s12 = sphi %s497_s12, %s13_s12  }
   0x2   : > { %p137_p1 = scmp.lt.s32.totalorder %s475_s12, 3 }
   0x4   : > { %p138_p2 = pnand %p364_p0, %p137_p1 }
   0x5   : > { %v173_v0 = vld [vmem:[%s583_s1] sm:$0xff] (!%p138_p2)  ;;  %v174_v1 = vld [vmem:[%s583_s1 + $0x8] sm:$0xff] (!%p138_p2)  ;;  %v175_v2 = vld [vmem:[%s583_s1 + $0x10] sm:$0xff] (!%p138_p2)  ;;  %p161_p3 = scmp.lt.s32.totalorder (!%p138_p2), %s360_s13, 1  ;;  %vm271_vm0 = vcmask (!%p138_p2), 64512  }
   0x6   : > { %141 = sbr.rel (%p138_p2) target bundleno = 311 (0x137), region = 32  ;;  %v427_v3 = vpack.c.bf16 (!%p138_p2), %v174_v1, %v173_v0  ;;  %v176_v4 = vld [vmem:[%s583_s1 + $0x18] sm:$0xff] (!%p138_p2)  ;;  %v177_v6 = vld [vmem:[%s583_s1 + $0x20] sm:$0xff] (!%p138_p2)  ;;  %v178_v7 = vld [vmem:[%s583_s1 + $0x28] sm:$0xff] (!%p138_p2) }
   0x7   : > { %v431_v5 = vpack.c.bf16 (!%p138_p2), %v176_v4, %v175_v2  ;;  %v435_v8 = vpack.c.bf16 (!%p138_p2), %v178_v7, %v177_v6  ;;  %v179_v9 = vld [vmem:[%s583_s1 + $0x30] sm:$0xff] (!%p138_p2)  ;;  %v180_v10 = vld [vmem:[%s583_s1 + $0x38] sm:$0xff] (!%p138_p2)  ;;  %v181_v13 = vld [vmem:[%s583_s1 + $0x40] sm:$0xff] (!%p138_p2) }
   0x8   : > { %428 = vmatprep.subr.bf16.mxu0 (!%p138_p2), %v427_v3  ;;  %v439_v12 = vpack.c.bf16 (!%p138_p2), %v180_v10, %v179_v9  ;;  %v182_v14 = vld [vmem:[%s583_s1 + $0x48] sm:$0xff] (!%p138_p2)  ;;  %v183_v16 = vld [vmem:[%s583_s1 + $0x50] sm:$0xff] (!%p138_p2)  ;;  %v184_v17 = vld [vmem:[%s583_s1 + $0x58] sm:$0xff] (!%p138_p2) }
   0x9   : > { %430 = vmatpush3.bf16.msra.mxu0 (!%p138_p2), %v427_v3  ;;  %v443_v15 = vpack.c.bf16 (!%p138_p2), %v182_v14, %v181_v13  ;;  %v447_v18 = vpack.c.bf16 (!%p138_p2), %v184_v17, %v183_v16  ;;  %v185_v19 = vld [vmem:[%s583_s1 + $0x60] sm:$0xff] (!%p138_p2)  ;;  %v186_v20 = vld [vmem:[%s583_s1 + $0x68] sm:$0xff] (!%p138_p2)  ;;  %v187_v22 = vld [vmem:[%s583_s1 + $0x70] sm:$0xff] (!%p138_p2) }
   0xa   : > { %432 = vmatprep.subr.bf16.mxu0 (!%p138_p2), %v431_v5  ;;  %v451_v21 = vpack.c.bf16 (!%p138_p2), %v186_v20, %v185_v19  ;;  %v188_v23 = vld [vmem:[%s583_s1 + $0x78] sm:$0xff] (!%p138_p2)  ;;  %v369_v26 = vld [vmem:[%s584_s2] ss:$0 sm:$0xff] (!%p138_p2) }
   0xb   : > { %v455_v24 = vpack.c.bf16 (!%p138_p2), %v188_v23, %v187_v22 }
   0xd   : > { %s587_s13 = smov (!%p161_p3, %s360_s13), 1  ;;  %434 = vmatpush3.bf16.msra.mxu0 %v431_v5 }
   0xe   : > { %s372_s26 = sshll.u32 %s587_s13, 4  ;;  %436 = vmatprep.subr.bf16.mxu0 %v435_v8 }
   0xf   : > { %s531_s29 = scalar_lea.vmem %s582_s0, %s372_s26  ;;  %s170_s30 = scalar_lea.vmem %s585_s3, %s372_s26 }
  0x10   : > { %v171_v11 = vld [vmem:[%s531_s29] sm:$0xff]  ;;  %v172_v25 = vld [vmem:[%s531_s29 + $0x8] sm:$0xff] }
  0x11   : > { %424 = vmatprep.mubr.f32.mxu0 %v171_v11  ;;  %438 = vmatpush3.bf16.msra.mxu0 %v435_v8 }
  0x12   : > { %440 = vmatprep.subr.bf16.mxu0 %v439_v12 }
  0x15   : > { %442 = vmatpush3.bf16.msra.mxu0 %v439_v12 }
  0x16   : > { %444 = vmatprep.subr.bf16.mxu0 %v443_v15 }
  0x19   : > { %446 = vmatpush3.bf16.msra.mxu0 %v443_v15 }
  0x1a   : > { %448 = vmatprep.subr.bf16.mxu0 %v447_v18 }
  0x1d   : > { %450 = vmatpush3.bf16.msra.mxu0 %v447_v18 }
  0x1e   : > { %452 = vmatprep.subr.bf16.mxu0 %v451_v21 }
  0x21   : > { %454 = vmatpush3.bf16.msra.mxu0 %v451_v21 }
  0x22   : > { %456 = vmatprep.subr.bf16.mxu0 %v455_v24 }
  0x25   : > { %458 = vmatpush3.bf16.msra.mxu0 %v455_v24 }
  0x28   : > { %425 = vmatmul.mubr.f32.vlgmr.msra.gmra.mrb[0].mxu0 %v172_v25 }
  0xfb   : > { %v426_v27 = vpop.f32.mrb[0].mxu0 }
  0xfc   : > { %v268_v28 = vadd.f32 %v426_v27, %v369_v26  ;;  %v262_v29 = vpop.f32.mrb[1].mxu0 }
  0xfd   : > { %v263_v30 = vadd.f32 %v369_v26, %v262_v29 }
  0xfe   : > { %v273_v31 = vsel %vm271_vm0, %v268_v28, 0.0 }
  0xff   : > { %v272_v32 = vsel %vm271_vm0, %v263_v30, 0.0 }
 0x100   : > { %v274_v33 = vadd.f32 %v273_v31, %v272_v32 }
 0x102   : > { %v275_v34 = vrot.slane %v274_v33, 4 }
 0x104   : > { %v276_v35 = vadd.f32 %v275_v34, %v274_v33 }
 0x106   : > { %v277_v36 = vrot.slane %v276_v35, 2 }
 0x108   : > { %v278_v37 = vadd.f32 %v277_v36, %v276_v35 }
 0x10a   : > { %v279_v38 = vrot.slane %v278_v37, 1 }
 0x10c   : > { %v280_v39 = vadd.f32 %v279_v38, %v278_v37 }
 0x10e   : > { %v282_v40 = vmul.f32 0.0625, %v280_v39 }
 0x110   : > { %v283_v41 = vsub.f32 %v263_v30, %v282_v40  ;;  %v284_v42 = vsub.f32 %v268_v28, %v282_v40 }
 0x112   : > { %v285_v43 = vmul.f32 %v283_v41, %v283_v41  ;;  %v286_v44 = vmul.f32 %v284_v42, %v284_v42 }
 0x114   : > { %v287_v45 = vsel %vm271_vm0, %v285_v43, 0.0  ;;  %v288_v46 = vsel %vm271_vm0, %v286_v44, 0.0 }
 0x115   : > { %v289_v47 = vadd.f32 %v288_v46, %v287_v45 }
 0x117   : > { %v290_v48 = vrot.slane %v289_v47, 4 }
 0x119   : > { %v291_v49 = vadd.f32 %v290_v48, %v289_v47 }
 0x11b   : > { %v292_v50 = vrot.slane %v291_v49, 2 }
 0x11d   : > { %v293_v51 = vadd.f32 %v292_v50, %v291_v49 }
 0x11f   : > { %v294_v52 = vrot.slane %v293_v51, 1 }
 0x121   : > { %v295_v53 = vadd.f32 %v294_v52, %v293_v51 }
 0x123   : > { %v296_v54 = vmul.f32 0.0625, %v295_v53 }
 0x125   : > { %v297_v55 = vadd.f32 1e-05, %v296_v54 }
 0x127   : > { %467 = vrsqrt.f32 %v297_v55 }
 0x131   : > { %v468_v56 = vpop.eup %467 }
 0x132   : > { %v299_v57 = vmul.f32 %v468_v56, %v283_v41  ;;  %v300_v58 = vmul.f32 %v468_v56, %v284_v42 }
 0x134   : > { %v301_v59 = vmax.f32 %v299_v57, 0.0  ;;  %v302_v60 = vmax.f32 %v300_v58, 0.0 }
 0x136   : > { %303 = vst.msk [vmem:[%s170_s30] sm:$0xff] %vm271_vm0, %v301_v59  ;;  %304 = vst.msk [vmem:[%s170_s30 + $0x8] sm:$0xff] %vm271_vm0, %v302_v60 }
 0x137 PF: > { %s13_s12 = sadd.s32 1, %s475_s12  }
 0x138   : > { %p10_p4 = scmp.ge.s32.totalorder %s13_s12, 4  }
 0x13a   :  { %12 = sbr.rel (!%p10_p4) target bundleno = 1 (0x1), region = 62 }

// kernel: multiblock_forward.7
= control target key start
LH: loop header
LB: loop body
LE: loop exit
PB: predicated region body
PF: predicated region fallthrough
CT: control target
= control target key end

     0   :  { %s2596_s0 = inlined_call_operand.vmem [shape: f32[2,8,16], index: 0, kind: input, shape index: {}]   ;;  %s2597_s1 = inlined_call_operand.vmem [shape: f32[2,8,16], index: 1, kind: input, shape index: {}]   ;;  %s2598_s2 = inlined_call_operand.vmem [shape: f32[16,16], index: 2, kind: input, shape index: {}]   ;;  %s2599_s3 = inlined_call_operand.vmem [shape: f32[1,16], index: 3, kind: input, shape index: {}]   ;;  %s2600_s4 = inlined_call_operand.vmem [shape: f32[16,16], index: 4, kind: input, shape index: {}]   ;;  %s2601_s5 = inlined_call_operand.vmem [shape: f32[1,16], index: 5, kind: input, shape index: {}]   ;;  %s2602_s6 = inlined_call_operand.vmem [shape: f32[16,48], index: 6, kind: input, shape index: {}]   ;;  %s2603_s7 = inlined_call_operand.vmem [shape: f32[1,48], index: 7, kind: input, shape index: {}]   ;;  %s2604_s8 = inlined_call_operand.vmem [shape: f32[16,48], index: 8, kind: input, shape index: {}]   ;;  %s2605_s9 = inlined_call_operand.vmem [shape: f32[1,48], index: 9, kind: input, shape index: {}]   ;;  %s2606_s10 = inlined_call_operand.vmem [shape: f32[16,16], index: 10, kind: input, shape index: {}]   ;;  %s2607_s11 = inlined_call_operand.vmem [shape: f32[1,16], index: 11, kind: input, shape index: {}]   ;;  %s2608_s12 = inlined_call_operand.vmem [shape: f32[16,16], index: 12, kind: input, shape index: {}]   ;;  %s2609_s13 = inlined_call_operand.vmem [shape: f32[1,16], index: 13, kind: input, shape index: {}]   ;;  %s2610_s14 = inlined_call_operand.hbm [shape: f32[2,8,16], index: 14, kind: output, shape index: {0}]   ;;  %s2611_s15 = inlined_call_operand.hbm [shape: f32[2,8,16], index: 15, kind: output, shape index: {1}]  }
   0x1   :  { %2615 = sst [smem:[#allocation10_spill]] %s2596_s0 }
   0x2   :  { %2616 = sst [smem:[#allocation11_spill]] %s2597_s1 }
   0x3   :  { %2617 = sst [smem:[#allocation12_spill]] %s2598_s2 }
   0x4   :  { %2618 = sst [smem:[#allocation13_spill]] %s2599_s3 }
   0x5   :  { %2619 = sst [smem:[#allocation14_spill]] %s2600_s4 }
   0x6   :  { %21 = vsyncpa [#allocation3], 0 }
   0x7   :  { %23 = vsyncpa [#allocation3 + $0x1], 0 }
   0x8   :  { %24 = vsyncpa [#allocation5], 0 }
   0x9   :  { %26 = vsyncpa [#allocation5 + $0x1], 0  ;;  %s2300_s18 = smov 0   ;;  %s2302_s19 = smov 0  }
   0xa   :  { %s2304_s20 = smov 0   ;;  %s2306_s21 = smov 0  }
   0xb LB: > { %2620 = sst [smem:[#allocation8_spill]] %s2204_s20  ;;  %s2321_s22 = sadd.s32 4294967295, %s2208_s21   ;;  %s2208_s21 = sphi %s2306_s21, %s2635_s21   ;;  %s2204_s20 = sphi %s2304_s20, %s2632_s20   ;;  %s2200_s19 = sphi %s2302_s19, %s2634_s19   ;;  %s2196_s18 = sphi %s2300_s18, %s2633_s18  }
   0xc   : > { %s1866_s23 = sadd.s32 4294967294, %s2208_s21   ;;  %s2325_s24 = sadd.s32 1, %s2208_s21  }
   0xd   : > { %s343_s25 = sadd.s32 1, %s2204_s20  ;;  %s340_s26 = ssub.s32 %s2208_s21, %s2325_s24 }
   0xe   : > { %p353_p0 = scmp.ne.s32.totalorder %s2204_s20, %s2200_s19  ;;  %p341_p1 = scmp.eq.s32.totalorder %s340_s26, 0 }
   0xf   : > { %p354_p2 = scmp.eq.s32.totalorder %s2321_s22, 1  ;;  %p359_p3 = scmp.ne.s32.totalorder %s2200_s19, %s2196_s18 }
  0x10   : > { %p360_p4 = scmp.eq.s32.totalorder %s1866_s23, 1  ;;  %p1869_p7 = scmp.ge.s32.totalorder %s2208_s21, 1 }
  0x11   : > { %s2336_s27 = scalar_select %p341_p1, %s2204_s20, %s343_s25  }
  0x12   : > { %p2338_p5 = por %p354_p2, %p353_p0  ;;  %p2342_p6 = por %p360_p4, %p359_p3 }
  0x13   : > { %2621 = sst [smem:[#allocation9_spill]] %s2336_s27  ;;  %p454_p8 = scmp.lt.s32.totalorder %s2208_s21, 3 }
  0x15   : > { %p455_p9 = pnand %p1869_p7, %p454_p8 }
  0x16   : > { %s2624_s2 = sld [smem:[#allocation12_spill]] (!%p455_p9)  ;;  %s2625_s4 = sld [smem:[#allocation14_spill]] (!%p455_p9)  ;;  %v2210_v3 = vmov (!%p455_p9), 0.0|0.0   ;;  %vm2211_vm0 = vmmov (!%p455_p9), 0   ;;  %v2212_v7 = vmov (!%p455_p9), 0.0   ;;  %vm520_vm1 = vcmask (!%p455_p9), 130048  }
  0x17   : > { %458 = sbr.rel (%p455_p9) target bundleno = 1613 (0x64d), region = 76  ;;  %2020 = vmatprep.subr.bf16.mxu0 (!%p455_p9), %v2210_v3  ;;  %2023 = vmatprep.subr.bf16.mxu1 (!%p455_p9), %v2210_v3  ;;  %p510_p10 = scmp.lt.s32.totalorder (!%p455_p9), %s2321_s22, 1  ;;  %v705_v24 = vld [vmem:[%s2602_s6] sm:$0xff] (!%p455_p9)  ;;  %v706_v25 = vld [vmem:[%s2602_s6 + $0x8] sm:$0xff] (!%p455_p9)  ;;  %v872_v58 = vlaneseq (!%p455_p9)  ;;  %vm882_vm2 = vcmask (!%p455_p9), 64512  }
  0x18   : > { %1942 = vmatprep.mubr.msk.f32.mxu0 (!%p455_p9), %vm2211_vm0, %v2212_v7  ;;  %1949 = vmatprep.mubr.msk.f32.mxu1 (!%p455_p9), %vm2211_vm0, %v2212_v7  ;;  %s2626_s0 = sld [smem:[#allocation10_spill]] (!%p455_p9)  ;;  %s2627_s1 = sld [smem:[#allocation11_spill]] (!%p455_p9)  ;;  %v788_v26 = vld [vmem:[%s2604_s8] sm:$0xff] (!%p455_p9)  ;;  %v789_v27 = vld [vmem:[%s2604_s8 + $0x8] sm:$0xff] (!%p455_p9)  ;;  %v2027_v30 = vpack.c.bf16 (!%p455_p9), %v706_v25, %v705_v24 }
  0x19   : > { %v2030_v33 = vpack.c.bf16 (!%p455_p9), %v789_v27, %v788_v26  ;;  %s2628_s3 = sld [smem:[#allocation13_spill]] (!%p455_p9)  ;;  %v624_v37 = vld [vmem:[%s2601_s5] sm:$0x1] (!%p455_p9)  ;;  %v873_v59 = vshrl.u32 (!%p455_p9), %v872_v58, 7  ;;  %s2215_s20 = smov (!%p455_p9), 96  }
  0x1a   : > { %v1878_v44 = vld [vmem:[%s2603_s7] ss:$0 sm:$0xff] (!%p455_p9)  ;;  %s2216_s27 = smov (!%p455_p9), 88  }
  0x1b   : > { %v1880_v48 = vld [vmem:[%s2605_s9] ss:$0 sm:$0xff] (!%p455_p9)  ;;  %v874_v60 = vsub.s32 (!%p455_p9), 0, %v873_v59 }
  0x1c   : > { %v539_v0 = vld [vmem:[%s2624_s2] sm:$0xff] (!%p455_p9)  ;;  %v540_v1 = vld [vmem:[%s2624_s2 + $0x8] sm:$0xff] (!%p455_p9) }
  0x1d   : > { %v622_v2 = vld [vmem:[%s2625_s4] sm:$0xff] (!%p455_p9)  ;;  %v2021_v4 = vpack.c.bf16 (!%p455_p9), %v540_v1, %v539_v0  ;;  %v623_v5 = vld [vmem:[%s2625_s4 + $0x8] sm:$0xff] (!%p455_p9) }
  0x1e   : > { %v2024_v6 = vpack.c.bf16 %v623_v5, %v622_v2  ;;  %s511_s30 = scalar_select %p510_p10, %s2321_s22, 1 }
  0x1f   : > { %2022 = vmatpush3.bf16.msra.mxu0 %v2021_v4  ;;  %v541_v36 = vld [vmem:[%s2628_s3] sm:$0x1] }
  0x20   : > { %2025 = vmatpush3.bf16.msra.mxu1 %v2024_v6  ;;  %2026 = vmatprep.subr.bf16.mxu0 %v2210_v3  ;;  %s1872_s16 = sshll.u32 %s511_s30, 3  ;;  %s2213_s30 = smov 112  }
  0x21   : > { %2029 = vmatprep.subr.bf16.mxu1 %v2210_v3  ;;  %s513_s17 = scalar_lea.vmem %s2626_s0, %s1872_s16  ;;  %s517_s26 = scalar_lea.vmem %s2627_s1, %s1872_s16 }
  0x22   : > { %v2376_v8 = vld [vmem:[%s513_s17] sm:$0xff]  ;;  %s2214_s16 = smov 120   ;;  %s2217_s0 = smov 8  }
  0x23   : > { %v2378_v9 = vld [vmem:[%s517_s26] sm:$0xff]  ;;  %v521_v10 = vsel %vm520_vm1, %v2376_v8, 0.0  ;;  %v704_v34 = vmax.f32 %v2376_v8, 0.0  ;;  %s2501_s17 = sand.u32 1, %s2200_s19   ;;  %s2614_s26 = sshll.u32 %s2321_s22, 7 }
  0x24   : > { %v530_v11 = vsel %vm520_vm1, %v2378_v9, 0.0  ;;  %v522_v12 = vrot.slane %v521_v10, 4  ;;  %v787_v35 = vmax.f32 %v2378_v9, 0.0  ;;  %s2515_s1 = scalar_lea.hbm %s2610_s14, %s2614_s26  ;;  %s1732_s23 = scalar_lea.sflag [#allocation3], %s2501_s17 }
  0x25   : > { %v531_v13 = vrot.slane %v530_v11, 4 }
  0x26   : > { %v523_v14 = vadd.f32 %v522_v12, %v521_v10 }
  0x27   : > { %v532_v15 = vadd.f32 %v531_v13, %v530_v11 }
  0x28   : > { %v524_v16 = vrot.slane %v523_v14, 2 }
  0x29   : > { %v533_v17 = vrot.slane %v532_v15, 2 }
  0x2a   : > { %v525_v18 = vadd.f32 %v524_v16, %v523_v14 }
  0x2b   : > { %v534_v19 = vadd.f32 %v533_v17, %v532_v15 }
  0x2c   : > { %v526_v20 = vrot.slane %v525_v18, 1 }
  0x2d   : > { %v535_v21 = vrot.slane %v534_v19, 1 }
  0x2e   : > { %v527_v22 = vadd.f32 %v526_v20, %v525_v18 }
  0x2f   : > { %v536_v23 = vadd.f32 %v535_v21, %v534_v19 }
  0x30   : > { %v529_v28 = vmul.f32 0.125, %v527_v22 }
  0x31   : > { %v537_v29 = vmul.f32 0.125, %v536_v23 }
  0x32   : > { %v538_v31 = vmax.f32 %v529_v28, 0.0 }
  0x33   : > { %v621_v32 = vmax.f32 %v537_v29, 0.0 }
  0x34   : > { %1943 = vmatmul.mubr.msk.f32.vlgmr.msra.gmra.mrb[0].mxu0 %vm520_vm1, %v538_v31 }
  0x35   : > { %1950 = vmatmul.mubr.msk.f32.vlgmr.msra.gmra.mrb[0].mxu1 %vm520_vm1, %v621_v32  ;;  %2028 = vmatpush3.bf16.msra.mxu0 %v2027_v30 }
  0x36   : > { %1956 = vmatprep.mubr.msk.f32.mxu0 %vm2211_vm0, %v2212_v7  ;;  %2031 = vmatpush3.bf16.msra.mxu1 %v2030_v33 }
  0x37   : > { %1963 = vmatprep.mubr.msk.f32.mxu1 %vm2211_vm0, %v2212_v7  ;;  %1966 = vmatprep.subr.mxu0 %v2212_v7 }
  0x38   : > { %1971 = vmatprep.subr.mxu1 %v2212_v7  ;;  %1957 = vmatmul.mubr.msk.f32.vlgmr.msra.gmra.mrb[2].mxu0 %vm520_vm1, %v704_v34 }
  0x39   : > { %1964 = vmatmul.mubr.msk.f32.vlgmr.msra.gmra.mrb[2].mxu1 %vm520_vm1, %v787_v35  ;;  %1968 = vmatprep.mubr.msk.f32.mxu0 %vm2211_vm0, %v2212_v7 }
  0x3a   : > { %1973 = vmatprep.mubr.msk.f32.mxu1 %vm2211_vm0, %v2212_v7 }
 0x107   : > { %v611_v38 = vpop.f32.mrb[0].mxu0 }
 0x108   : > { %v694_v39 = vpop.f32.mrb[0].mxu1  ;;  %v612_v40 = vadd.f32 %v611_v38, %v541_v36  ;;  %v1944_v42 = vpop.f32.mrb[1].mxu0 }
 0x109   : > { %v695_v41 = vadd.f32 %v694_v39, %v624_v37  ;;  %v1951_v43 = vpop.f32.mrb[1].mxu1 }
 0x10a   : > { %v1875_v45 = vmul.f32 -1.442695, %v612_v40 }
 0x10b   : > { %v1877_v46 = vmul.f32 -1.442695, %v695_v41  ;;  %v783_v47 = vpop.f32.mrb[2].mxu0 }
 0x10c   : > { %2090 = vpow2.f32 %v1875_v45  ;;  %v2424_v49 = vadd.f32 %v1878_v44, %v783_v47  ;;  %v1958_v50 = vpop.f32.mrb[3].mxu0  ;;  %v866_v51 = vpop.f32.mrb[2].mxu1 }
 0x10d   : > { %2092 = vpow2.f32 %v1877_v46  ;;  %v1965_v52 = vpop.f32.mrb[3].mxu1  ;;  %v2427_v53 = vadd.f32 %v1880_v48, %v866_v51 }
 0x10e   : > { %877 = vrot.lane.b32.xlu0 %v2424_v49, %s2213_s30 }
 0x112   : > { %1223 = vrot.lane.b32.xlu0 %v2427_v53, %s2213_s30 }
 0x116   : > { %v2091_v54 = vpop.eup %2090 }
 0x117   : > { %v2093_v55 = vpop.eup %2092  ;;  %v618_v56 = vadd.f32 1.0, %v2091_v54 }
 0x118   : > { %v701_v57 = vadd.f32 1.0, %v2093_v55 }
 0x119   : > { %2094 = vrcp.f32 %v618_v56 }
 0x11a   : > { %2096 = vrcp.f32 %v701_v57 }
 0x123   : > { %v2095_v61 = vpop.eup %2094 }
 0x124   : > { %v2097_v62 = vpop.eup %2096  ;;  %v871_v63 = vadd.f32 1.0, %v2095_v61 }
 0x125   : > { %v870_v0 = vadd.f32 1.0, %v2097_v62 }
 0x126   : > { %v1221_v1 = vrot.slane %v871_v63, %v874_v60 }
 0x127   : > { %v875_v2 = vrot.slane %v870_v0, %v874_v60 }
 0x128   : > { %v1227_v4 = vmul.f32 %v1221_v1, %v2427_v53 }
 0x129   : > { %v881_v5 = vmul.f32 %v875_v2, %v2424_v49 }
 0x12a   : > { %1394 = vrot.lane.b32.xlu0 %v1227_v4, %s2214_s16 }
 0x12b   : > { %1049 = vrot.lane.b32.xlu1 %v881_v5, %s2214_s16  ;;  %1967 = vmatpush3.xpose.msk.msra.mxu0 %vm882_vm2, %v881_v5 }
 0x12c   : > { %1976 = vmatprep.subr.mxu0 %v2212_v7 }
 0x180   : > { %v878_v6 = vpop.permute.xlu0 %877 }
 0x181   : > { %v880_v10 = vmul.f32 %v878_v6, %v875_v2 }
 0x183   : > { %1047 = vrot.lane.b32.xlu1 %v880_v10, %s2214_s16  ;;  %1969 = vmatmul.mubr.msk.f32.vlgmr.msra.gmra.mrb[4].mxu0 %vm882_vm2, %v880_v10 }
 0x184   : > { %v1224_v11 = vpop.permute.xlu0 %1223  ;;  %1978 = vmatprep.mubr.msk.f32.mxu0 %vm2211_vm0, %v2212_v7 }
 0x185   : > { %v1226_v12 = vmul.f32 %v1224_v11, %v1221_v1  ;;  %v1564_v11 = vld [vmem:[%s2606_s10] sm:$0xff] }
 0x187   : > { %1392 = vrot.lane.b32.xlu1 %v1226_v12, %s2214_s16 }
 0x19c   : > { %v1395_v15 = vpop.permute.xlu0 %1394 }
 0x19d   : > { %v1050_v13 = vpop.permute.xlu1 %1049 }
 0x19e   : > { %1977 = vmatpush3.xpose.msk.msra.mxu0 %vm882_vm2, %v1050_v13 }
 0x19f   : > { %1986 = vmatprep.subr.mxu0 %v2212_v7 }
 0x1f5   : > { %v1048_v14 = vpop.permute.xlu1 %1047 }
 0x1f6   : > { %1979 = vmatmul.mubr.msk.f32.vlgmr.msra.gmra.mrb[6].mxu0 %vm882_vm2, %v1048_v14 }
 0x1f7   : > { %1987 = vmatpush3.xpose.msk.msra.mxu0 %vm882_vm2, %v1227_v4  ;;  %1988 = vmatprep.mubr.msk.f32.mxu0 %vm2211_vm0, %v2212_v7 }
 0x1f8   : > { %1996 = vmatprep.subr.mxu0 %v2212_v7 }
 0x1f9   : > { %v1393_v16 = vpop.permute.xlu1 %1392 }
 0x1fa   : > { %1989 = vmatmul.mubr.msk.f32.vlgmr.msra.gmra.mrb[8].mxu0 %vm882_vm2, %v1226_v12  ;;  %v1565_v12 = vld [vmem:[%s2606_s10 + $0x8] sm:$0xff] }
 0x1fb   : > { %1997 = vmatpush3.xpose.msk.msra.mxu0 %vm882_vm2, %v1395_v15  ;;  %1998 = vmatprep.mubr.msk.f32.mxu0 %vm2211_vm0, %v2212_v7  ;;  %v2033_v13 = vpack.c.bf16 %v1565_v12, %v1564_v11 }
 0x1fc   : > { %2032 = vmatprep.subr.bf16.mxu0 %v2210_v3 }
 0x1fe   : > { %1999 = vmatmul.mubr.msk.f32.vlgmr.msra.gmra.mrb[10].mxu0 %vm882_vm2, %v1393_v16 }
 0x1ff   : > { %2010 = vmatprep.mubr.msk.f32.mxu0 %vm2211_vm0, %v2212_v7  ;;  %2034 = vmatpush3.bf16.msra.mxu0 %v2033_v13 }
 0x256   : > { %v955_v17 = vpop.f32.mrb[4].mxu0 }
 0x257   : > { %v959_v18 = vmul.f32 0.35355338, %v955_v17  ;;  %v1970_v19 = vpop.f32.mrb[5].mxu0 }
 0x259   : > { %v960_v20 = vsel %vm882_vm2, %v959_v18, -inf }
 0x25a   : > { %961 = vmax.xlane.f32.xlu0 %v960_v20 }
 0x2c9   : > { %v1121_v21 = vpop.f32.mrb[6].mxu0 }
 0x2ca   : > { %v1125_v22 = vmul.f32 0.35355338, %v1121_v21  ;;  %v1980_v23 = vpop.f32.mrb[7].mxu0 }
 0x2cc   : > { %v1126_v24 = vsel %vm882_vm2, %v1125_v22, -inf }
 0x2cd   : > { %1127 = vmax.xlane.f32.xlu1 %v1126_v24  ;;  %v1300_v25 = vpop.f32.mrb[8].mxu0 }
 0x2ce   : > { %v1304_v26 = vmul.f32 0.35355338, %v1300_v25  ;;  %v1990_v27 = vpop.f32.mrb[9].mxu0 }
 0x2d0   : > { %v1305_v28 = vsel %vm882_vm2, %v1304_v26, -inf }
 0x2d1   : > { %1306 = vmax.xlane.f32.xlu0 %v1305_v28  ;;  %v1466_v29 = vpop.f32.mrb[10].mxu0 }
 0x2d2   : > { %v1470_v30 = vmul.f32 0.35355338, %v1466_v29  ;;  %v2000_v31 = vpop.f32.mrb[11].mxu0 }
 0x2d4   : > { %v1471_v32 = vsel %vm882_vm2, %v1470_v30, -inf }
 0x2d5   : > { %1472 = vmax.xlane.f32.xlu0 %v1471_v32 }
 0x2de   : > { %971 = vrot.lane.b32.xlu1 %v2424_v49, %s2215_s20 }
 0x2e7   : > { %v962_v33 = vpop.xlane.xlu0 %961 }
 0x2e8   : > { %v963_v34 = vsub.f32 %v959_v18, %v962_v33 }
 0x2ea   : > { %v964_v35 = vmul.f32 1.442695, %v963_v34 }
 0x2ec   : > { %2098 = vpow2.f32 %v964_v35 }
 0x2f6   : > { %v2099_v36 = vpop.eup %2098 }
 0x2f7   : > { %v966_v37 = vsel %vm882_vm2, %v2099_v36, 0.0 }
 0x302   : > { %967 = vadd.xlane.f32.xlu1 %v966_v37 }
 0x35a   : > { %v1128_v38 = vpop.xlane.xlu1 %1127 }
 0x35b   : > { %v1129_v39 = vsub.f32 %v1125_v22, %v1128_v38 }
 0x35d   : > { %v1130_v40 = vmul.f32 1.442695, %v1129_v39 }
 0x35e   : > { %v972_v41 = vpop.permute.xlu1 %971  ;;  %v1307_v42 = vpop.xlane.xlu0 %1306 }
 0x35f   : > { %2100 = vpow2.f32 %v1130_v40  ;;  %v1308_v43 = vsub.f32 %v1304_v26, %v1307_v42  ;;  %1972 = vmatpush3.msra.mxu1 %v972_v41 }
 0x360   : > { %1981 = vmatprep.subr.mxu1 %v2212_v7 }
 0x361   : > { %v1309_v44 = vmul.f32 1.442695, %v1308_v43 }
 0x362   : > { %v1473_v45 = vpop.xlane.xlu0 %1472 }
 0x363   : > { %2102 = vpow2.f32 %v1309_v44  ;;  %v1474_v46 = vsub.f32 %v1470_v30, %v1473_v45 }
 0x365   : > { %v1475_v47 = vmul.f32 1.442695, %v1474_v46 }
 0x367   : > { %2104 = vpow2.f32 %v1475_v47 }
 0x369   : > { %v2101_v48 = vpop.eup %2100 }
 0x36a   : > { %v1132_v50 = vsel %vm882_vm2, %v2101_v48, 0.0 }
 0x36b   : > { %1133 = vadd.xlane.f32.xlu0 %v1132_v50 }
 0x36d   : > { %v2103_v51 = vpop.eup %2102 }
 0x36e   : > { %v1311_v52 = vsel %vm882_vm2, %v2103_v51, 0.0 }
 0x36f   : > { %1312 = vadd.xlane.f32.xlu1 %v1311_v52 }
 0x371   : > { %v2105_v54 = vpop.eup %2104 }
 0x372   : > { %v1477_v55 = vsel %vm882_vm2, %v2105_v54, 0.0 }
 0x373   : > { %1478 = vadd.xlane.f32.xlu0 %v1477_v55 }
 0x380   : > { %1316 = vrot.lane.b32.xlu1 %v2427_v53, %s2215_s20 }
 0x384   : > { %1482 = vrot.lane.b32.xlu1 %v2427_v53, %s2216_s27 }
 0x389   : > { %1137 = vrot.lane.b32.xlu0 %v2424_v49, %s2216_s27 }
 0x38f   : > { %v968_v56 = vpop.xlane.xlu1 %967 }
 0x390   : > { %2106 = vrcp.f32 %v968_v56 }
 0x39a   : > { %v2107_v57 = vpop.eup %2106 }
 0x39b   : > { %v970_v58 = vmul.f32 %v2107_v57, %v2099_v36 }
 0x39d   : > { %1974 = vmatmul.mubr.msk.f32.vlgmr.msra.gmra.mrb[4].mxu1 %vm882_vm2, %v970_v58 }
 0x39e   : > { %1983 = vmatprep.mubr.msk.f32.mxu1 %vm2211_vm0, %v2212_v7 }
 0x3f8   : > { %v1134_v59 = vpop.xlane.xlu0 %1133 }
 0x3f9   : > { %2108 = vrcp.f32 %v1134_v59 }
 0x3fc   : > { %v1313_v60 = vpop.xlane.xlu1 %1312 }
 0x3fd   : > { %2110 = vrcp.f32 %v1313_v60 }
 0x400   : > { %v1479_v61 = vpop.xlane.xlu0 %1478  ;;  %v1317_v53 = vpop.permute.xlu1 %1316 }
 0x401   : > { %2112 = vrcp.f32 %v1479_v61 }
 0x403   : > { %v2109_v62 = vpop.eup %2108 }
 0x404   : > { %v1136_v63 = vmul.f32 %v2109_v62, %v2101_v48  ;;  %v1138_v0 = vpop.permute.xlu0 %1137  ;;  %v1483_v2 = vpop.permute.xlu1 %1482 }
 0x405   : > { %1982 = vmatpush3.msra.mxu1 %v1138_v0 }
 0x406   : > { %1984 = vmatmul.mubr.msk.f32.vlgmr.msra.gmra.mrb[6].mxu1 %vm882_vm2, %v1136_v63  ;;  %1991 = vmatprep.subr.mxu1 %v2212_v7 }
 0x407   : > { %v2111_v49 = vpop.eup %2110  ;;  %1992 = vmatpush3.msra.mxu1 %v1317_v53  ;;  %1993 = vmatprep.mubr.msk.f32.mxu1 %vm2211_vm0, %v2212_v7 }
 0x408   : > { %v1315_v1 = vmul.f32 %v2111_v49, %v2103_v51  ;;  %2001 = vmatprep.subr.mxu1 %v2212_v7 }
 0x40a   : > { %1994 = vmatmul.mubr.msk.f32.vlgmr.msra.gmra.mrb[8].mxu1 %vm882_vm2, %v1315_v1 }
 0x40b   : > { %v2113_v4 = vpop.eup %2112  ;;  %2002 = vmatpush3.msra.mxu1 %v1483_v2  ;;  %2003 = vmatprep.mubr.msk.f32.mxu1 %vm2211_vm0, %v2212_v7 }
 0x40c   : > { %v1481_v5 = vmul.f32 %v2113_v4, %v2105_v54  ;;  %2035 = vmatprep.subr.bf16.mxu1 %v2210_v3  ;;  %v1648_v3 = vld [vmem:[%s2608_s12] sm:$0xff] }
 0x40e   : > { %2004 = vmatmul.mubr.msk.f32.vlgmr.msra.gmra.mrb[10].mxu1 %vm882_vm2, %v1481_v5 }
 0x40f   : > { %2017 = vmatprep.mubr.msk.f32.mxu1 %vm2211_vm0, %v2212_v7  ;;  %v1649_v7 = vld [vmem:[%s2608_s12 + $0x8] sm:$0xff] }
 0x410   : > { %v2036_v14 = vpack.c.bf16 %v1649_v7, %v1648_v3 }
 0x412   : > { %2037 = vmatpush3.bf16.msra.mxu1 %v2036_v14 }
 0x470   : > { %v1043_v6 = vpop.f32.mrb[4].mxu1 }
 0x471   : > { %v1975_v10 = vpop.f32.mrb[5].mxu1 }
 0x4d9   : > { %v1209_v15 = vpop.f32.mrb[6].mxu1 }
 0x4da   : > { %1214 = vrot.lane.b32.xlu0 %v1209_v15, %s2217_s0  ;;  %v1985_v16 = vpop.f32.mrb[7].mxu1 }
 0x4dd   : > { %v1388_v17 = vpop.f32.mrb[8].mxu1 }
 0x4de   : > { %v1995_v18 = vpop.f32.mrb[9].mxu1 }
 0x4e1   : > { %v1554_v19 = vpop.f32.mrb[10].mxu1 }
 0x4e2   : > { %1559 = vrot.lane.b32.xlu1 %v1554_v19, %s2217_s0  ;;  %v2005_v20 = vpop.f32.mrb[11].mxu1  ;;  %s2613_s0 = sshll.u32 %s2501_s17, 3 }
 0x4e3   : > { %s502_s30 = scalar_lea.vmem [#allocation2], %s2613_s0  ;;  %s2218_s0 = smov [#allocation2]  }
 0x4e4   : > { %s1750_s16 = sshll.u32 %s502_s30, 4  ;;  %s2118_s2 = sshll.u32 %s2218_s0, 4  ;;  %s2517_s16 = int_to_ptr.vmem [resolvable:$true] %s1750_s16  ;;  %s2119_s2 = int_to_ptr.vmem [resolvable:$false] %s2118_s2 }
 0x4e5   : > { %s2114_s25 = scalar_lea.vmem %s2517_s16, 128  ;;  %s2120_s3 = scalar_lea.vmem %s2119_s2, 256 }
 0x4e6   : > { %p2115_p11 = scmp.ne.s32.totalorder %s2517_s16, %s2114_s25  ;;  %p2121_p0 = scmp.lt.s32.totalorder %s2517_s16, %s2119_s2 }
 0x4e7   : > { %p2122_p1 = scmp.lt.s32.totalorder %s2120_s3, %s2114_s25 }
 0x4e8   : > { %p2116_p12 = pnand %p2115_p11, %p2338_p5 }
 0x4e9   : > { %p2123_p2 = por %p2122_p1, %p2121_p0 }
 0x4ea   : > { %p2117_p13 = pneg %p2116_p12 }
 0x4ec   : > { %p2124_p3 = pnand %p2123_p2, %p2117_p13 }
 0x54c   : > { %v1215_v21 = vpop.permute.xlu0 %1214 }
 0x54d   : > { %v1217_v22 = vsel %vm882_vm2, %v1043_v6, %v1215_v21 }
 0x54e   : > { %v1563_v23 = vadd.f32 %v1217_v22, %v2376_v8  ;;  %v1894_v8 = vld [vmem:[%s2607_s11] ss:$0 sm:$0xff] }
 0x550   : > { %2011 = vmatmul.mubr.msk.f32.vlgmr.msra.gmra.mrb[12].mxu0 %vm520_vm1, %v1563_v23 }
 0x554   : > { %v1560_v24 = vpop.permute.xlu1 %1559 }
 0x555   : > { %v1562_v25 = vsel %vm882_vm2, %v1388_v17, %v1560_v24 }
 0x556   : > { %v1647_v26 = vadd.f32 %v1562_v25, %v2378_v9 }
 0x558   : > { %2018 = vmatmul.mubr.msk.f32.vlgmr.msra.gmra.mrb[12].mxu1 %vm520_vm1, %v1647_v26 }
 0x623   : > { %v1642_v27 = vpop.f32.mrb[12].mxu0 }
 0x624   : > { %v1643_v28 = vadd.f32 %v1894_v8, %v1642_v27  ;;  %v2012_v9 = vpop.f32.mrb[13].mxu0 }
 0x626   : > { %1646 = vst.msk [vmem:[%s502_s30] sm:$0xff] %vm520_vm1, %v1643_v28 }
 0x627   : > { %2127 = shalt.err (!%p2124_p3)
}
 0x628   : > { %s2128_s30 = scalar_lea.hbm %s2515_s1, 128  ;;  %s2132_s0 = scalar_lea.hbm %s2610_s14, 256 }
 0x629   : > { %p2129_p4 = scmp.ne.s32.totalorder %s2515_s1, %s2128_s30  ;;  %p2133_p9 = scmp.lt.u32.totalorder %s2515_s1, %s2610_s14 }
 0x62a   : > { %p2134_p10 = scmp.lt.u32.totalorder %s2132_s0, %s2128_s30  ;;  %p2136_p12 = scmp.lt.u32.totalorder %s2128_s30, %s2515_s1 }
 0x62b   : > { %p2130_p7 = pnand %p2129_p4, %p2338_p5 }
 0x62c   : > { %p2135_p11 = por %p2134_p10, %p2133_p9 }
 0x62d   : > { %p2131_p8 = pneg %p2130_p7 }
 0x62e   : > { %p2137_p13 = por %p2136_p12, %p2135_p11 }
 0x630   : > { %p2138_p0 = pnand %p2137_p13, %p2131_p8 }
 0x632   : > { %2141 = shalt.err (!%p2138_p0)
}
 0x633   : > { %2038 = dma.vmem_to_hbm [thread:$0]  (%p2338_p5), %s2517_s16, 128, %s2515_s1, %s1732_s23   ;;  %v1896_v29 = vld [vmem:[%s2609_s13] ss:$0 sm:$0xff]  ;;  %v1726_v30 = vpop.f32.mrb[12].mxu1 }
 0x634   : > { %s2629_s26 = sshll.u32 %s2501_s17, 3  ;;  %v1727_v31 = vadd.f32 %v1896_v29, %v1726_v30  ;;  %v2019_v32 = vpop.f32.mrb[13].mxu1  ;;  %s2630_s30 = sshll.u32 %s2321_s22, 7 }
 0x635   : > { %s509_s20 = scalar_lea.vmem [#allocation4], %s2629_s26  ;;  %s2552_s4 = scalar_lea.hbm %s2611_s15, %s2630_s30 }
 0x636   : > { %s1763_s27 = sshll.u32 %s509_s20, 4  ;;  %1730 = vst.msk [vmem:[%s509_s20] sm:$0xff] %vm520_vm1, %v1727_v31  ;;  %s1737_s1 = scalar_lea.sflag [#allocation5], %s2501_s17  ;;  %s2554_s27 = int_to_ptr.vmem [resolvable:$true] %s1763_s27 }
 0x637   : > { %s2142_s16 = scalar_lea.vmem %s2554_s27, 128  ;;  %s2219_s23 = smov [#allocation4]  }
 0x638   : > { %p2143_p1 = scmp.ne.s32.totalorder %s2554_s27, %s2142_s16  ;;  %s2146_s22 = sshll.u32 %s2219_s23, 4  ;;  %s2147_s22 = int_to_ptr.vmem [resolvable:$false] %s2146_s22 }
 0x639   : > { %s2148_s3 = scalar_lea.vmem %s2147_s22, 256  ;;  %p2149_p4 = scmp.lt.s32.totalorder %s2554_s27, %s2147_s22 }
 0x63a   : > { %p2144_p2 = pnand %p2143_p1, %p2338_p5  ;;  %p2150_p7 = scmp.lt.s32.totalorder %s2148_s3, %s2142_s16 }
 0x63c   : > { %p2145_p3 = pneg %p2144_p2  ;;  %p2151_p8 = por %p2150_p7, %p2149_p4 }
 0x63e   : > { %p2152_p9 = pnand %p2151_p8, %p2145_p3 }
 0x640   : > { %2155 = shalt.err (!%p2152_p9)
}
 0x641   : > { %s2156_s17 = scalar_lea.hbm %s2552_s4, 128  ;;  %s2160_s20 = scalar_lea.hbm %s2611_s15, 256 }
 0x642   : > { %p2157_p10 = scmp.ne.s32.totalorder %s2552_s4, %s2156_s17  ;;  %p2161_p13 = scmp.lt.u32.totalorder %s2552_s4, %s2611_s15 }
 0x643   : > { %p2162_p0 = scmp.lt.u32.totalorder %s2160_s20, %s2156_s17  ;;  %p2164_p2 = scmp.lt.u32.totalorder %s2156_s17, %s2552_s4 }
 0x644   : > { %p2158_p11 = pnand %p2157_p10, %p2338_p5 }
 0x645   : > { %p2163_p1 = por %p2162_p0, %p2161_p13 }
 0x646   : > { %p2159_p12 = pneg %p2158_p11 }
 0x647   : > { %p2165_p3 = por %p2164_p2, %p2163_p1 }
 0x649   : > { %p2166_p4 = pnand %p2165_p3, %p2159_p12 }
 0x64b   : > { %2169 = shalt.err (!%p2166_p4)
}
 0x64c   : > { %2039 = dma.vmem_to_hbm [thread:$0]  (%p2338_p5), %s2554_s27, 128, %s2552_s4, %s1737_s1  }
 0x64d PF: > { %p2049_p7 = scmp.ge.s32.totalorder %s2208_s21, 2  ;;  %s1775_s2 = sand.u32 1, %s2196_s18  }
 0x64e   : > { %s1776_s16 = scalar_lea.sflag [#allocation3], %s1775_s2 }
 0x64f   : > { %p2043_p8 = pnand %p2049_p7, %p2342_p6 }
 0x651   : > { %2187 = dma.done.wait (!%p2043_p8), %s1776_s16, 128  }
 0x652   : > { %2189 = vsyncadd (!%p2043_p8), %s1776_s16, 4294967168  ;;  %s1785_s23 = scalar_lea.sflag [#allocation5], %s1775_s2 }
 0x653   : > { %2191 = dma.done.wait (!%p2043_p8), %s1785_s23, 128  }
 0x654   : > { %2193 = vsyncadd (!%p2043_p8), %s1785_s23, 4294967168  ;;  %s2631_s28 = sld [smem:[#allocation8_spill]]  ;;  %s2632_s20 = sld [smem:[#allocation9_spill]] }
 0x655   : > { %p29_p5 = scmp.ge.s32.totalorder %s2325_s24, 4   ;;  %s2633_s18 = smov %s2200_s19 }
 0x656   : > { %s2635_s21 = smov %s2325_s24 }
 0x657   :  { %31 = sbr.rel (!%p29_p5) target bundleno = 11 (0xb), region = 131 }
 0x65a   : > { %s2634_s19 = smov %s2631_s28 }
 0x65e   :  { %1790 = vsyncpa [#allocation3], 1 }
 0x65f   :  { %1792 = vsyncpa [#allocation3 + $0x1], 1 }
 0x660   :  { %1793 = vsyncpa [#allocation5], 1 }
 0x661   :  { %1795 = vsyncpa [#allocation5 + $0x1], 1 }

// kernel: multiblock_forward.6
= control target key start
LH: loop header
LB: loop body
LE: loop exit
PB: predicated region body
PF: predicated region fallthrough
CT: control target
= control target key end

     0   :  { %s2248_s29 = smov 0   ;;  %s2529_s0 = inlined_call_operand.vmem [shape: f32[2,8,16], index: 0, kind: input, shape index: {}]   ;;  %s2530_s1 = inlined_call_operand.vmem [shape: f32[2,8,256], index: 1, kind: input, shape index: {}]   ;;  %s2531_s2 = inlined_call_operand.vmem [shape: f32[2,8,16], index: 2, kind: input, shape index: {}]   ;;  %s2532_s3 = inlined_call_operand.vmem [shape: f32[8,8], index: 3, kind: input, shape index: {}]   ;;  %s2533_s4 = inlined_call_operand.vmem [shape: f32[8,1], index: 4, kind: input, shape index: {}]   ;;  %s2534_s5 = inlined_call_operand.vmem [shape: f32[16,48], index: 5, kind: input, shape index: {}]   ;;  %s2535_s6 = inlined_call_operand.vmem [shape: f32[1,48], index: 6, kind: input, shape index: {}]   ;;  %s2536_s7 = inlined_call_operand.vmem [shape: f32[16,48], index: 7, kind: input, shape index: {}]   ;;  %s2537_s8 = inlined_call_operand.vmem [shape: f32[1,48], index: 8, kind: input, shape index: {}]   ;;  %s2538_s9 = inlined_call_operand.vmem [shape: f32[272,16], index: 9, kind: input, shape index: {}]   ;;  %s2539_s10 = inlined_call_operand.vmem [shape: f32[1,16], index: 10, kind: input, shape index: {}]   ;;  %s2540_s11 = inlined_call_operand.vmem [shape: f32[32,16], index: 11, kind: input, shape index: {}]   ;;  %s2541_s12 = inlined_call_operand.vmem [shape: f32[1,16], index: 12, kind: input, shape index: {}]   ;;  %s2542_s13 = inlined_call_operand.vmem [shape: f32[2,8,16], index: 13, kind: output, shape index: {0}]   ;;  %s2543_s14 = inlined_call_operand.vmem [shape: f32[2,8,16], index: 14, kind: output, shape index: {1}]  }
   0x1 LB: > { %s1889_s30 = sadd.s32 4294967295, %s2161_s29   ;;  %p1893_p0 = scmp.ge.s32.totalorder %s2161_s29, 1  ;;  %s2161_s29 = sphi %s2248_s29, %s25_s29  }
   0x2   : > { %p433_p1 = scmp.lt.s32.totalorder %s2161_s29, 3 }
   0x4   : > { %p434_p2 = pnand %p1893_p0, %p433_p1 }
   0x5   : > { %p490_p3 = scmp.lt.s32.totalorder (!%p434_p2), %s1889_s30, 1  ;;  %v2163_v0 = vmov (!%p434_p2), 0.0   ;;  %vm2164_vm0 = vmmov (!%p434_p2), 0   ;;  %v514_v1 = vld [vmem:[%s2533_s4] sm:$0xff] (!%p434_p2)  ;;  %v2165_v2 = vmov (!%p434_p2), 0   ;;  %v597_v4 = vld [vmem:[%s2534_s5 + $0x8] sm:$0xff] (!%p434_p2) }
   0x6   : > { %437 = sbr.rel (%p434_p2) target bundleno = 2116 (0x844), region = 72  ;;  %1993 = vmatprep.subr.mxu1 (!%p434_p2), %v2163_v0  ;;  %1995 = vmatprep.mubr.msk.f32.mxu1 (!%p434_p2), %vm2164_vm0, %v2163_v0  ;;  %v596_v3 = vld [vmem:[%s2534_s5] sm:$0xff] (!%p434_p2)  ;;  %vm520_vm1 = vcmask (!%p434_p2), 64512   ;;  %v2166_v10 = vmov (!%p434_p2), 0.0|0.0   ;;  %vm605_vm2 = vcmask (!%p434_p2), 130048   ;;  %v681_v12 = vld [vmem:[%s2536_s7 + $0x8] sm:$0xff] (!%p434_p2) }
   0x7   : > { %2138 = vset.pattern.permute.xlu0 (!%p434_p2), %v2165_v2  ;;  %2027 = vmatprep.subr.mxu0 (!%p434_p2), %v2163_v0  ;;  %v513_v5 = vld [vmem:[%s2532_s3] sm:$0xff] (!%p434_p2)  ;;  %v2074_v6 = vpack.c.bf16 (!%p434_p2), %v597_v4, %v596_v3  ;;  %s2167_s23 = smov (!%p434_p2), 112   ;;  %s2168_s26 = smov (!%p434_p2), 96  }
   0x8   : > { %517 = vperm.xlu0 (!%p434_p2), %2138, %v514_v1   ;;  %2029 = vmatprep.mubr.msk.f32.mxu0 (!%p434_p2), %vm2164_vm0, %v2163_v0  ;;  %v680_v11 = vld [vmem:[%s2536_s7] sm:$0xff] (!%p434_p2)  ;;  %s2170_s28 = smov (!%p434_p2), 120   ;;  %s2171_s15 = smov (!%p434_p2), 88  }
   0x9   : > { %v2077_v13 = vpack.c.bf16 (!%p434_p2), %v681_v12, %v680_v11  ;;  %v1901_v18 = vld [vmem:[%s2535_s6] ss:$0 sm:$0xff] (!%p434_p2) }
   0xa   : > { %v1903_v24 = vld [vmem:[%s2537_s8] ss:$0 sm:$0xff] (!%p434_p2) }
   0xd   : > { %s2545_s30 = smov (!%p490_p3, %s1889_s30), 1 }
   0xe   : > { %s2274_s21 = sshll.u32 %s2545_s30, 3 }
   0xf   : > { %s493_s24 = scalar_lea.vmem %s2529_s0, %s2274_s21  ;;  %s502_s27 = scalar_lea.vmem %s2531_s2, %s2274_s21 }
  0x10   : > { %v511_v7 = vld [vmem:[%s493_s24] sm:$0xff]  ;;  %s1924_s24 = sshll.u32 %s2545_s30, 4  ;;  %s506_s22 = scalar_lea.vmem %s2542_s13, %s2274_s21 }
  0x11   : > { %v2287_v8 = vld [vmem:[%s502_s27] sm:$0xff]  ;;  %v595_v9 = vmax.f32 %v511_v7, 0.0  ;;  %s2169_s27 = smov 104   ;;  %s2421_s20 = scalar_lea.vmem %s2530_s1, %s1924_s24 }
  0x12   : > { %1994 = vmatpush3.msra.mxu1 %v2287_v8 }
  0x13   : > { %1996 = vmatmul.mubr.msk.f32.vlgmr.msra.gmra.mrb[0].mxu1 %vm520_vm1, %v513_v5  ;;  %2073 = vmatprep.subr.bf16.mxu1 %v2166_v10 }
  0x14   : > { %2075 = vmatpush3.bf16.msra.mxu1 %v2074_v6  ;;  %2002 = vmatprep.mubr.msk.f32.mxu1 %vm2164_vm0, %v2163_v0 }
  0x15   : > { %2076 = vmatprep.subr.bf16.mxu1 %v2166_v10 }
  0x17   : > { %2003 = vmatmul.mubr.msk.f32.vlgmr.msra.gmra.mrb[2].mxu1 %vm605_vm2, %v595_v9 }
  0x18   : > { %2009 = vmatprep.mubr.msk.f32.mxu1 %vm2164_vm0, %v2163_v0  ;;  %2078 = vmatpush3.bf16.msra.mxu1 %v2077_v13 }
  0x19   : > { %2012 = vmatprep.subr.mxu1 %v2163_v0 }
  0x87   : > { %v518_v14 = vpop.permute.xlu0 %517 }
  0xe6   : > { %v590_v15 = vpop.f32.mrb[0].mxu1 }
  0xe7   : > { %v591_v16 = vadd.f32 %v590_v15, %v518_v14  ;;  %v1997_v17 = vpop.f32.mrb[1].mxu1 }
  0xe9   : > { %v594_v19 = vmax.f32 %v591_v16, 0.0 }
  0xea   : > { %v675_v20 = vpop.f32.mrb[2].mxu1 }
  0xeb   : > { %v679_v21 = vmax.f32 %v594_v19, 0.0  ;;  %v2308_v22 = vadd.f32 %v1901_v18, %v675_v20  ;;  %v2004_v23 = vpop.f32.mrb[3].mxu1 }
  0xed   : > { %2010 = vmatmul.mubr.msk.f32.vlgmr.msra.gmra.mrb[4].mxu1 %vm605_vm2, %v679_v21  ;;  %763 = vrot.lane.b32.xlu0 %v2308_v22, %s2167_s23 }
  0xee   : > { %2014 = vmatprep.mubr.msk.f32.mxu1 %vm2164_vm0, %v2163_v0 }
 0x15f   : > { %v764_v28 = vpop.permute.xlu0 %763 }
 0x1c0   : > { %v758_v25 = vpop.f32.mrb[4].mxu1 }
 0x1c1   : > { %v2317_v26 = vadd.f32 %v1903_v24, %v758_v25  ;;  %v2011_v27 = vpop.f32.mrb[5].mxu1 }
 0x1c2   : > { %v1450_v27 = vld [vmem:[%s2538_s9 + $0x80] sm:$0xff] }
 0x1c3   : > { %852 = vrot.lane.b32.xlu0 %v2317_v26, %s2168_s26  ;;  %2013 = vmatpush3.xpose.msk.msra.mxu1 %vm520_vm1, %v2317_v26 }
 0x1c4   : > { %2017 = vmatprep.subr.mxu1 %v2163_v0 }
 0x1c6   : > { %2015 = vmatmul.mubr.msk.f32.vlgmr.msra.gmra.mrb[6].mxu1 %vm520_vm1, %v764_v28  ;;  %v1451_v28 = vld [vmem:[%s2538_s9 + $0x88] sm:$0xff] }
 0x1c7   : > { %928 = vrot.lane.b32.xlu0 %v2308_v22, %s2169_s27  ;;  %2019 = vmatprep.mubr.msk.f32.mxu1 %vm2164_vm0, %v2163_v0 }
 0x1cb   : > { %1099 = vrot.lane.b32.xlu0 %v2317_v26, %s2167_s23  ;;  %s2172_s23 = smov 8  }
 0x1cf   : > { %1265 = vrot.lane.b32.xlu0 %v2308_v22, %s2170_s28 }
 0x1d3   : > { %1263 = vrot.lane.b32.xlu0 %v2317_v26, %s2169_s27 }
 0x235   : > { %v853_v29 = vpop.permute.xlu0 %852 }
 0x236   : > { %2018 = vmatpush3.msra.mxu1 %v853_v29  ;;  %v1434_v29 = vld [vmem:[%s2538_s9] sm:$0xff] }
 0x237   : > { %2022 = vmatprep.subr.mxu1 %v2163_v0 }
 0x239   : > { %v929_v40 = vpop.permute.xlu0 %928 }
 0x23d   : > { %v1100_v43 = vpop.permute.xlu0 %1099 }
 0x241   : > { %v1266_v45 = vpop.permute.xlu0 %1265 }
 0x245   : > { %v1264_v46 = vpop.permute.xlu0 %1263 }
 0x299   : > { %v836_v30 = vpop.f32.mrb[6].mxu1 }
 0x29a   : > { %v840_v31 = vmul.f32 0.35355338, %v836_v30  ;;  %v2016_v32 = vpop.f32.mrb[7].mxu1  ;;  %v2082_v30 = vpack.c.bf16 %v1451_v28, %v1450_v27  ;;  %v1471_v27 = vld [vmem:[%s2540_s11 + $0x18] sm:$0xff] }
 0x29b   : > { %v1452_v32 = vld [vmem:[%s2538_s9 + $0x90] sm:$0xff] }
 0x29c   : > { %v841_v33 = vsel %vm520_vm1, %v840_v31, -inf }
 0x29d   : > { %842 = vmax.xlane.f32.xlu1 %v841_v33  ;;  %v1453_v33 = vld [vmem:[%s2538_s9 + $0x98] sm:$0xff] }
 0x32a   : > { %v843_v34 = vpop.xlane.xlu1 %842 }
 0x32b   : > { %v844_v35 = vsub.f32 %v840_v31, %v843_v34  ;;  %v1435_v31 = vld [vmem:[%s2538_s9 + $0x8] sm:$0xff] }
 0x32c   : > { %v2084_v34 = vpack.c.bf16 %v1435_v31, %v1434_v29  ;;  %v1468_v31 = vld [vmem:[%s2540_s11] sm:$0xff] }
 0x32d   : > { %v845_v36 = vmul.f32 1.442695, %v844_v35  ;;  %v2086_v35 = vpack.c.bf16 %v1453_v33, %v1452_v32  ;;  %v1469_v32 = vld [vmem:[%s2540_s11 + $0x8] sm:$0xff] }
 0x32e   : > { %v2118_v33 = vpack.c.bf16 %v1469_v32, %v1468_v31 }
 0x32f   : > { %2139 = vpow2.f32 %v845_v36  ;;  %v1436_v36 = vld [vmem:[%s2538_s9 + $0x10] sm:$0xff] }
 0x339   : > { %v2140_v37 = vpop.eup %2139 }
 0x33a   : > { %v847_v38 = vsel %vm520_vm1, %v2140_v37, 0.0 }
 0x33b   : > { %848 = vadd.xlane.f32.xlu1 %v847_v38  ;;  %v1454_v38 = vld [vmem:[%s2538_s9 + $0xa0] sm:$0xff] }
 0x34c   : > { %930 = vrot.lane.b32.xlu1 %v2317_v26, %s2170_s28  ;;  %s510_s28 = scalar_lea.vmem %s2543_s14, %s2274_s21 }
 0x3c8   : > { %v849_v39 = vpop.xlane.xlu1 %848 }
 0x3c9   : > { %2141 = vrcp.f32 %v849_v39  ;;  %v1455_v39 = vld [vmem:[%s2538_s9 + $0xa8] sm:$0xff] }
 0x3cc   : > { %v931_v44 = vpop.permute.xlu1 %930 }
 0x3d3   : > { %v2142_v41 = vpop.eup %2141 }
 0x3d4   : > { %v851_v42 = vmul.f32 %v2142_v41, %v2140_v37  ;;  %v1437_v37 = vld [vmem:[%s2538_s9 + $0x18] sm:$0xff]  ;;  %v2090_v41 = vpack.c.bf16 %v1455_v39, %v1454_v38  ;;  %v1918_v38 = vld [vmem:[%s2539_s10] ss:$0 sm:$0xff] }
 0x3d6   : > { %2020 = vmatmul.mubr.msk.f32.vlgmr.msra.gmra.mrb[8].mxu1 %vm520_vm1, %v851_v42  ;;  %v1438_v42 = vld [vmem:[%s2538_s9 + $0x20] sm:$0xff] }
 0x3d7   : > { %2023 = vmatpush3.xpose.msk.msra.mxu1 %vm520_vm1, %v931_v44  ;;  %2024 = vmatprep.mubr.msk.f32.mxu1 %vm2164_vm0, %v2163_v0  ;;  %v1456_v44 = vld [vmem:[%s2538_s9 + $0xb0] sm:$0xff] }
 0x3d8   : > { %2032 = vmatprep.subr.mxu1 %v2163_v0 }
 0x3da   : > { %2025 = vmatmul.mubr.msk.f32.vlgmr.msra.gmra.mrb[10].mxu1 %vm520_vm1, %v929_v40  ;;  %v2088_v40 = vpack.c.bf16 %v1437_v37, %v1436_v36 }
 0x3db   : > { %2033 = vmatpush3.xpose.msk.msra.mxu1 %vm520_vm1, %v2308_v22  ;;  %2034 = vmatprep.mubr.msk.f32.mxu1 %vm2164_vm0, %v2163_v0 }
 0x3dc   : > { %2042 = vmatprep.subr.mxu1 %v2163_v0 }
 0x3de   : > { %2035 = vmatmul.mubr.msk.f32.vlgmr.msra.gmra.mrb[12].mxu1 %vm520_vm1, %v1100_v43  ;;  %v1439_v43 = vld [vmem:[%s2538_s9 + $0x28] sm:$0xff] }
 0x3df   : > { %2043 = vmatpush3.xpose.msk.msra.mxu1 %vm520_vm1, %v1266_v45  ;;  %2044 = vmatprep.mubr.msk.f32.mxu1 %vm2164_vm0, %v2163_v0  ;;  %v1457_v45 = vld [vmem:[%s2538_s9 + $0xb8] sm:$0xff] }
 0x3e0   : > { %2079 = vmatprep.subr.bf16.mxu1 %v2166_v10 }
 0x3e2   : > { %2045 = vmatmul.mubr.msk.f32.vlgmr.msra.gmra.mrb[14].mxu1 %vm520_vm1, %v1264_v46  ;;  %v2092_v46 = vpack.c.bf16 %v1439_v43, %v1438_v42 }
 0x3e3   : > { %2056 = vmatprep.mubr.msk.f32.mxu1 %vm2164_vm0, %v2163_v0 }
 0x4a9   : > { %v2354_v47 = vpop.f32.mrb[8].mxu1 }
 0x4aa   : > { %v2021_v48 = vpop.f32.mrb[9].mxu1 }
 0x4ab   : > { %v2094_v48 = vpack.c.bf16 %v1457_v45, %v1456_v44 }
 0x4ad   : > { %v1002_v49 = vpop.f32.mrb[10].mxu1 }
 0x4ae   : > { %v1006_v50 = vmul.f32 0.35355338, %v1002_v49  ;;  %v2026_v51 = vpop.f32.mrb[11].mxu1  ;;  %v1440_v49 = vld [vmem:[%s2538_s9 + $0x30] sm:$0xff] }
 0x4af   : > { %v1458_v51 = vld [vmem:[%s2538_s9 + $0xc0] sm:$0xff] }
 0x4b0   : > { %v1007_v52 = vsel %vm520_vm1, %v1006_v50, -inf }
 0x4b1   : > { %1008 = vmax.xlane.f32.xlu1 %v1007_v52  ;;  %v1171_v53 = vpop.f32.mrb[12].mxu1  ;;  %v1459_v52 = vld [vmem:[%s2538_s9 + $0xc8] sm:$0xff] }
 0x4b2   : > { %v1175_v54 = vmul.f32 0.35355338, %v1171_v53  ;;  %v2036_v55 = vpop.f32.mrb[13].mxu1  ;;  %v1473_v53 = vld [vmem:[%s2421_s20 + $0x8] sm:$0xff] }
 0x4b3   : > { %v1467_v55 = vld [vmem:[%s2538_s9 + $0x108] sm:$0xff] }
 0x4b4   : > { %v1176_v56 = vsel %vm520_vm1, %v1175_v54, -inf }
 0x4b5   : > { %1177 = vmax.xlane.f32.xlu0 %v1176_v56  ;;  %v1337_v57 = vpop.f32.mrb[14].mxu1 }
 0x4b6   : > { %v1341_v58 = vmul.f32 0.35355338, %v1337_v57  ;;  %v2046_v59 = vpop.f32.mrb[15].mxu1 }
 0x4b7   : > { %v1442_v59 = vld [vmem:[%s2538_s9 + $0x40] sm:$0xff] }
 0x4b8   : > { %v1342_v60 = vsel %vm520_vm1, %v1341_v58, -inf }
 0x4b9   : > { %1343 = vmax.xlane.f32.xlu0 %v1342_v60  ;;  %v1443_v60 = vld [vmem:[%s2538_s9 + $0x48] sm:$0xff] }
 0x53e   : > { %v1009_v61 = vpop.xlane.xlu1 %1008 }
 0x53f   : > { %v1010_v62 = vsub.f32 %v1006_v50, %v1009_v61  ;;  %v1441_v50 = vld [vmem:[%s2538_s9 + $0x38] sm:$0xff]  ;;  %v1460_v61 = vld [vmem:[%s2538_s9 + $0xd0] sm:$0xff] }
 0x540   : > { %v2096_v56 = vpack.c.bf16 %v1441_v50, %v1440_v49 }
 0x541   : > { %v1011_v63 = vmul.f32 1.442695, %v1010_v62  ;;  %v1461_v62 = vld [vmem:[%s2538_s9 + $0xd8] sm:$0xff] }
 0x542   : > { %v1178_v1 = vpop.xlane.xlu0 %1177 }
 0x543   : > { %2143 = vpow2.f32 %v1011_v63  ;;  %v1179_v2 = vsub.f32 %v1175_v54, %v1178_v1  ;;  %v1466_v54 = vld [vmem:[%s2538_s9 + $0x100] sm:$0xff]  ;;  %v2100_v63 = vpack.c.bf16 %v1443_v60, %v1442_v59  ;;  %v2102_v1 = vpack.c.bf16 %v1461_v62, %v1460_v61 }
 0x544   : > { %v2080_v57 = vpack.c.bf16 %v1467_v55, %v1466_v54 }
 0x545   : > { %v1180_v3 = vmul.f32 1.442695, %v1179_v2  ;;  %v1444_v2 = vld [vmem:[%s2538_s9 + $0x50] sm:$0xff] }
 0x546   : > { %v1344_v9 = vpop.xlane.xlu0 %1343  ;;  %2081 = vmatpush3.bf16.msra.mxu1 %v2080_v57 }
 0x547   : > { %2145 = vpow2.f32 %v1180_v3  ;;  %v1345_v11 = vsub.f32 %v1341_v58, %v1344_v9  ;;  %v2098_v58 = vpack.c.bf16 %v1459_v52, %v1458_v51  ;;  %2114 = vmatprep.subr.bf16.mxu1 %v2166_v10  ;;  %v1445_v3 = vld [vmem:[%s2538_s9 + $0x58] sm:$0xff]  ;;  %v1446_v9 = vld [vmem:[%s2538_s9 + $0x60] sm:$0xff] }
 0x549   : > { %v1346_v12 = vmul.f32 1.442695, %v1345_v11  ;;  %v1447_v11 = vld [vmem:[%s2538_s9 + $0x68] sm:$0xff] }
 0x54b   : > { %2147 = vpow2.f32 %v1346_v12  ;;  %v1464_v12 = vld [vmem:[%s2538_s9 + $0xf0] sm:$0xff] }
 0x54d   : > { %v2144_v4 = vpop.eup %2143 }
 0x54e   : > { %v1013_v5 = vsel %vm520_vm1, %v2144_v4, 0.0 }
 0x54f   : > { %1014 = vadd.xlane.f32.xlu1 %v1013_v5  ;;  %v1463_v5 = vld [vmem:[%s2538_s9 + $0xe8] sm:$0xff] }
 0x551   : > { %v2146_v6 = vpop.eup %2145 }
 0x552   : > { %v1182_v7 = vsel %vm520_vm1, %v2146_v6, 0.0 }
 0x553   : > { %1183 = vadd.xlane.f32.xlu0 %v1182_v7 }
 0x555   : > { %v2148_v13 = vpop.eup %2147 }
 0x556   : > { %v1348_v14 = vsel %vm520_vm1, %v2148_v13, 0.0 }
 0x560   : > { %1187 = vrot.lane.b32.xlu1 %v2308_v22, %s2168_s26 }
 0x569   : > { %1018 = vrot.lane.b32.xlu0 %v2317_v26, %s2171_s15 }
 0x584   : > { %1349 = vadd.xlane.f32.xlu1 %v1348_v14  ;;  %v2108_v14 = vpack.c.bf16 %v1447_v11, %v1446_v9 }
 0x595   : > { %1353 = vrot.lane.b32.xlu1 %v2308_v22, %s2171_s15 }
 0x5dc   : > { %v1015_v15 = vpop.xlane.xlu1 %1014 }
 0x5dd   : > { %2149 = vrcp.f32 %v1015_v15 }
 0x5e0   : > { %v1184_v16 = vpop.xlane.xlu0 %1183  ;;  %v1188_v20 = vpop.permute.xlu1 %1187 }
 0x5e1   : > { %2151 = vrcp.f32 %v1184_v16  ;;  %v1448_v16 = vld [vmem:[%s2538_s9 + $0x70] sm:$0xff] }
 0x5e4   : > { %v1019_v17 = vpop.permute.xlu0 %1018 }
 0x5e5   : > { %2028 = vmatpush3.msra.mxu0 %v1019_v17  ;;  %v1449_v17 = vld [vmem:[%s2538_s9 + $0x78] sm:$0xff] }
 0x5e6   : > { %2037 = vmatprep.subr.mxu0 %v2163_v0 }
 0x5e7   : > { %v2150_v18 = vpop.eup %2149 }
 0x5e8   : > { %v1017_v19 = vmul.f32 %v2150_v18, %v2144_v4  ;;  %v1462_v4 = vld [vmem:[%s2538_s9 + $0xe0] sm:$0xff]  ;;  %v2112_v18 = vpack.c.bf16 %v1449_v17, %v1448_v16 }
 0x5e9   : > { %v2106_v7 = vpack.c.bf16 %v1463_v5, %v1462_v4 }
 0x5ea   : > { %2030 = vmatmul.mubr.msk.f32.vlgmr.msra.gmra.mrb[0].mxu0 %vm520_vm1, %v1017_v19  ;;  %v1472_v19 = vld [vmem:[%s2421_s20] sm:$0xff] }
 0x5eb   : > { %v2152_v21 = vpop.eup %2151  ;;  %2038 = vmatpush3.msra.mxu0 %v1188_v20  ;;  %2039 = vmatprep.mubr.msk.f32.mxu0 %vm2164_vm0, %v2163_v0 }
 0x5ec   : > { %v1186_v23 = vmul.f32 %v2152_v21, %v2146_v6  ;;  %2047 = vmatprep.subr.mxu0 %v2163_v0  ;;  %v2104_v6 = vpack.c.bf16 %v1445_v3, %v1444_v2 }
 0x5ee   : > { %2040 = vmatmul.mubr.msk.f32.vlgmr.msra.gmra.mrb[2].mxu0 %vm520_vm1, %v1186_v23 }
 0x5ef   : > { %2049 = vmatprep.mubr.msk.f32.mxu0 %vm2164_vm0, %v2163_v0 }
 0x611   : > { %v1350_v22 = vpop.xlane.xlu1 %1349 }
 0x612   : > { %2153 = vrcp.f32 %v1350_v22 }
 0x615   : > { %v1354_v24 = vpop.permute.xlu1 %1353 }
 0x616   : > { %2048 = vmatpush3.msra.mxu0 %v1354_v24 }
 0x617   : > { %2083 = vmatprep.subr.bf16.mxu0 %v2082_v30 }
 0x61c   : > { %v2154_v25 = vpop.eup %2153 }
 0x61d   : > { %v1352_v26 = vmul.f32 %v2154_v25, %v2148_v13  ;;  %v1465_v13 = vld [vmem:[%s2538_s9 + $0xf8] sm:$0xff] }
 0x61e   : > { %v2110_v15 = vpack.c.bf16 %v1465_v13, %v1464_v12 }
 0x61f   : > { %2050 = vmatmul.mubr.msk.f32.vlgmr.msra.gmra.mrb[4].mxu0 %vm520_vm1, %v1352_v26  ;;  %v1470_v26 = vld [vmem:[%s2540_s11 + $0x10] sm:$0xff] }
 0x620   : > { %2085 = vmatpush3.bf16.msra.mxu0 %v2084_v34  ;;  %1611 = vmatprep.mubr.f32.mxu0 %v1473_v53  ;;  %v2115_v28 = vpack.c.bf16 %v1471_v27, %v1470_v26 }
 0x621   : > { %2087 = vmatprep.subr.bf16.mxu0 %v2086_v35 }
 0x624   : > { %2089 = vmatpush3.bf16.msra.mxu0 %v2088_v40 }
 0x625   : > { %2091 = vmatprep.subr.bf16.mxu0 %v2090_v41 }
 0x628   : > { %2093 = vmatpush3.bf16.msra.mxu0 %v2092_v46 }
 0x629   : > { %2095 = vmatprep.subr.bf16.mxu0 %v2094_v48 }
 0x62c   : > { %2097 = vmatpush3.bf16.msra.mxu0 %v2096_v56 }
 0x62d   : > { %2099 = vmatprep.subr.bf16.mxu0 %v2098_v58 }
 0x630   : > { %2101 = vmatpush3.bf16.msra.mxu0 %v2100_v63 }
 0x631   : > { %2103 = vmatprep.subr.bf16.mxu0 %v2102_v1 }
 0x634   : > { %2105 = vmatpush3.bf16.msra.mxu0 %v2104_v6 }
 0x635   : > { %2107 = vmatprep.subr.bf16.mxu0 %v2106_v7 }
 0x638   : > { %2109 = vmatpush3.bf16.msra.mxu0 %v2108_v14 }
 0x639   : > { %2111 = vmatprep.subr.bf16.mxu0 %v2110_v15 }
 0x63c   : > { %2113 = vmatpush3.bf16.msra.mxu0 %v2112_v18 }
 0x63f   : > { %1612 = vmatmul.mubr.f32.vlgmr.msra.gmra.mrb[6].mxu0 %v1472_v19 }
 0x6bd   : > { %v1090_v20 = vpop.f32.mrb[0].mxu0 }
 0x6be   : > { %1095 = vrot.lane.b32.xlu0 %v1090_v20, %s2172_s23  ;;  %v2031_v21 = vpop.f32.mrb[1].mxu0 }
 0x6c1   : > { %v1259_v23 = vpop.f32.mrb[2].mxu0 }
 0x6c2   : > { %v2041_v22 = vpop.f32.mrb[3].mxu0 }
 0x6f2   : > { %v1425_v24 = vpop.f32.mrb[4].mxu0 }
 0x6f3   : > { %1430 = vrot.lane.b32.xlu1 %v1425_v24, %s2172_s23  ;;  %v2051_v25 = vpop.f32.mrb[5].mxu0 }
 0x730   : > { %v1096_v29 = vpop.permute.xlu0 %1095 }
 0x731   : > { %v1098_v30 = vsel %vm520_vm1, %v2354_v47, %v1096_v29 }
 0x732   : > { %2057 = vmatmul.mubr.msk.f32.vlgmr.msra.gmra.mrb[16].mxu1 %vm605_vm2, %v1098_v30 }
 0x733   : > { %2116 = vmatpush3.bf16.msra.mxu1 %v2115_v28  ;;  %2063 = vmatprep.mubr.msk.f32.mxu1 %vm2164_vm0, %v2163_v0 }
 0x734   : > { %2117 = vmatprep.subr.bf16.mxu1 %v2166_v10  ;;  %v1984_v10 = vpop.f32.mrb[6].mxu0 }
 0x735   : > { %v1985_v35 = vpop.f32.mrb[7].mxu0 }
 0x736   : > { %v1986_v36 = vadd.f32 %v1985_v35, %v1984_v10 }
 0x765   : > { %v1431_v34 = vpop.permute.xlu1 %1430 }
 0x766   : > { %v1433_v47 = vsel %vm520_vm1, %v1259_v23, %v1431_v34 }
 0x767   : > { %2064 = vmatmul.mubr.msk.f32.vlgmr.msra.gmra.mrb[18].mxu1 %vm605_vm2, %v1433_v47 }
 0x768   : > { %2119 = vmatpush3.bf16.msra.mxu1 %v2118_v33  ;;  %2070 = vmatprep.mubr.msk.f32.mxu1 %vm2164_vm0, %v2163_v0 }
 0x76b   : > { %2071 = vmatmul.mubr.msk.f32.vlgmr.msra.gmra.mrb[20].mxu1 %vm605_vm2, %v2287_v8  ;;  %v1921_v8 = vld [vmem:[%s2541_s12] ss:$0 sm:$0xff] }
 0x805   : > { %v1543_v37 = vpop.f32.mrb[16].mxu1 }
 0x806   : > { %v1614_v39 = vadd.f32 %v1986_v36, %v1543_v37  ;;  %v2058_v40 = vpop.f32.mrb[17].mxu1 }
 0x808   : > { %v1624_v41 = vadd.f32 %v1918_v38, %v1614_v39 }
 0x80a   : > { %1625 = vst.msk [vmem:[%s506_s22] sm:$0xff] %vm605_vm2, %v1624_v41 }
 0x83a   : > { %v1695_v0 = vpop.f32.mrb[18].mxu1 }
 0x83b   : > { %v2065_v42 = vpop.f32.mrb[19].mxu1 }
 0x83e   : > { %v1768_v43 = vpop.f32.mrb[20].mxu1 }
 0x83f   : > { %v1769_v44 = vadd.f32 %v1768_v43, %v1695_v0  ;;  %v2072_v45 = vpop.f32.mrb[21].mxu1 }
 0x841   : > { %v1779_v46 = vadd.f32 %v1921_v8, %v1769_v44 }
 0x843   : > { %1780 = vst.msk [vmem:[%s510_s28] sm:$0xff] %vm605_vm2, %v1779_v46 }
 0x844 PF: > { %s25_s29 = sadd.s32 1, %s2161_s29  }
 0x845   : > { %p22_p4 = scmp.ge.s32.totalorder %s25_s29, 4  }
 0x847   :  { %24 = sbr.rel (!%p22_p4) target bundleno = 1 (0x1), region = 120 }

</bundles_post_ra>
